<compile_context>
chip_gen: v6e
topology: v6e:2x2x1
jax: 0.10.0
libtpu: 0.0.40
codegen_flags: <defaults>
</compile_context>

<pallas_src>
import functools

import jax
import jax.numpy as jnp
from jax import lax
from jax.experimental import pallas as pl
from jax.experimental.pallas import tpu as pltpu


# --------------------------------------------------------------------------
# In-kernel helpers
# --------------------------------------------------------------------------

def _dwconv3x3(h_hwc, wd_ref, pad_ref, stride):
    """3x3 depthwise conv, padding=1, stride in {1, 2}.

    h_hwc  : (H, W, C) f32 value.
    wd_ref : (9, C) ref; tap k corresponds to (di, dj) = (k // 3, k % 3).
    pad_ref: (H+2, W+2, >=C) VMEM scratch (only channels [0:C] are touched).

    Returns (Ho, Wo, C) f32 with Ho = (H-1)//stride + 1 (PyTorch Conv2d with
    kernel=3, padding=1).
    """
    H, W, C = h_hwc.shape
    Ho = (H - 1) // stride + 1
    Wo = (W - 1) // stride + 1

    # Zero only the 1-pixel halo ring; the interior is fully overwritten below.
    # (Done every step: the batch grid axis is "parallel", so a megacore core
    # may start at a grid index > 0 with an uninitialised scratch.)
    zrow = jnp.zeros((1, W + 2, C), jnp.float32)
    zcol = jnp.zeros((H, 1, C), jnp.float32)
    pad_ref[0:1, :, 0:C] = zrow
    pad_ref[H + 1:H + 2, :, 0:C] = zrow
    pad_ref[1:H + 1, 0:1, 0:C] = zcol
    pad_ref[1:H + 1, W + 1:W + 2, 0:C] = zcol
    pad_ref[1:H + 1, 1:W + 1, 0:C] = h_hwc

    wd = wd_ref[...]                                             # single load
    taps = [wd[k:k + 1, :].reshape(1, 1, C) for k in range(9)]   # hoisted
    acc = jnp.zeros((Ho, Wo, C), jnp.float32)
    for k in range(9):
        di, dj = k // 3, k % 3
        if stride == 1:
            v = pad_ref[di:di + H, dj:dj + W, 0:C]
        else:
            # Strided reads: only the (Ho, Wo) output positions are read and
            # accumulated -- no selection matmul, 4x less tap work at stride 2.
            v = pad_ref[pl.ds(di, Ho, 2), pl.ds(dj, Wo, 2), 0:C]
        acc = acc + v * taps[k]
    return acc


def _dot_bf16(a_f32, w_bf16_ref):
    """1x1 conv as a matmul: bf16 operands at the MXU, f32 accumulate."""
    return jnp.dot(a_f32.astype(jnp.bfloat16), w_bf16_ref[...],
                   preferred_element_type=jnp.float32)


# --------------------------------------------------------------------------
# Fused kernels
# --------------------------------------------------------------------------

def _edge_block_kernel(x_ref, wd_l_ref, sb_in_ref, w1l_ref,
                       w1r_ref, wd_r_ref, w3r_ref, sb_c_ref,
                       o_ref, pad_ref, *, stride):
    """benchmodel=2: left branch + right branch + [left|right] concat.

    sb_in_ref : (2, Cin) rows = [s1_left, b1_left]
    sb_c_ref  : (8, C)   rows = [s2l, b2l, s1r, b1r, s2r, b2r, s3r, b3r]
    o_ref     : (Po, 2C) with Po = Ho*Wo; channel_shuffle happens in wrapper.
    """
    H, W, Cin = x_ref.shape
    Po, C2 = o_ref.shape
    C = C2 // 2

    x = x_ref[...].astype(jnp.float32)                 # (H, W, Cin)
    xf = x.reshape(H * W, Cin)

    # ---- left branch: dwconv3x3 -> BN -> 1x1 -> BN -> ReLU -----------------
    acc_l = _dwconv3x3(x, wd_l_ref, pad_ref, stride).reshape(Po, Cin)
    g_l = acc_l * sb_in_ref[0:1, :] + sb_in_ref[1:2, :]
    y_l = _dot_bf16(g_l, w1l_ref)
    y_l = jnp.maximum(y_l * sb_c_ref[0:1, :] + sb_c_ref[1:2, :], 0.0)   # (Po, C)

    # ---- right branch: 1x1 -> BN -> ReLU -> dwconv -> BN -> 1x1 -> BN -> ReLU
    h = _dot_bf16(xf, w1r_ref)
    h = jnp.maximum(h * sb_c_ref[2:3, :] + sb_c_ref[3:4, :], 0.0)       # (P, C)
    acc_r = _dwconv3x3(h.reshape(H, W, C), wd_r_ref, pad_ref,
                       stride).reshape(Po, C)
    g_r = acc_r * sb_c_ref[4:5, :] + sb_c_ref[5:6, :]
    y_r = _dot_bf16(g_r, w3r_ref)
    y_r = jnp.maximum(y_r * sb_c_ref[6:7, :] + sb_c_ref[7:8, :], 0.0)   # (Po, C)

    # ---- plain [left | right] concat; shuffle is folded into wrapper -------
    o_ref[:, 0:C] = y_l.astype(o_ref.dtype)
    o_ref[:, C:2 * C] = y_r.astype(o_ref.dtype)


def _split_block_kernel(x_ref, w1_ref, wd_ref, w3_ref, sb_ref, o_ref, pad_ref):
    """benchmodel=1 (stride 1): x1 passthrough | Base_block(x2), [x1|y2] concat.

    x_ref  : (H, W, 2C)  -- first C channels are x1, last C are x2.
    sb_ref : (6, C) rows = [s1, b1, s2, b2, s3, b3]
    """
    H, W, C2 = x_ref.shape
    C = C2 // 2
    P = H * W

    x = x_ref[...].astype(jnp.float32)                  # (H, W, 2C)
    x1f = x[:, :, 0:C].reshape(P, C)
    x2f = x[:, :, C:2 * C].reshape(P, C)

    h = _dot_bf16(x2f, w1_ref)
    h = jnp.maximum(h * sb_ref[0:1, :] + sb_ref[1:2, :], 0.0)
    acc = _dwconv3x3(h.reshape(H, W, C), wd_ref, pad_ref, 1).reshape(P, C)
    g = acc * sb_ref[2:3, :] + sb_ref[3:4, :]
    y2 = _dot_bf16(g, w3_ref)
    y2 = jnp.maximum(y2 * sb_ref[4:5, :] + sb_ref[5:6, :], 0.0)

    o_ref[:, 0:C] = x1f.astype(o_ref.dtype)
    o_ref[:, C:2 * C] = y2.astype(o_ref.dtype)


# --------------------------------------------------------------------------
# pallas_call wrappers
# --------------------------------------------------------------------------

_COMPILER_PARAMS = pltpu.CompilerParams(
    dimension_semantics=("parallel",),       # batch grid axis -> 2 TCs on v7x
    vmem_limit_bytes=48 * 1024 * 1024,       # <= v7x's 64 MiB physical VMEM
)


def _whole_spec(a):
    """Whole-array block with a constant index map (weights / packed BN)."""
    nd = a.ndim
    return pl.BlockSpec(a.shape, lambda b: (0,) * nd)


def edgecrnn_residual_forward(x_nchw, params, benchmodel, stride):
    assert stride in (1, 2)
    B, Cin, H, W = x_nchw.shape

    # Single NCHW -> NHWC pass on the input (one HBM pass).
    x_nhwc = jnp.transpose(x_nchw, (0, 2, 3, 1))

    if benchmodel == 1:
        assert stride == 1  # shapes only line up for stride 1 in this branch
        C = Cin // 2
        Ho, Wo = H, W
        kp = params["banch2"]
        ops = (x_nhwc, kp["w1"], kp["wd"], kp["w3"], kp["sb"])
        kernel = _split_block_kernel
        pad_c = C
    else:
        lp, rp = params["banch1"], params["banch2"]
        C = rp["w1"].shape[1]                              # oup_inc
        Ho = (H - 1) // stride + 1
        Wo = (W - 1) // stride + 1
        sb_c = jnp.concatenate([lp["sb_out"], rp["sb"]], axis=0)   # (8, C)
        ops = (x_nhwc, lp["wd"], lp["sb_in"], lp["w1"],
               rp["w1"], rp["wd"], rp["w3"], sb_c)
        kernel = functools.partial(_edge_block_kernel, stride=stride)
        pad_c = max(Cin, C)                                # shared pad scratch

    Po = Ho * Wo
    in_specs = [pl.BlockSpec((None, H, W, x_nhwc.shape[-1]),
                             lambda b: (b, 0, 0, 0))]
    in_specs += [_whole_spec(a) for a in ops[1:]]

    out_flat = pl.pallas_call(
        kernel,
        grid=(B,),
        in_specs=in_specs,
        out_specs=pl.BlockSpec((None, Po, 2 * C), lambda b: (b, 0, 0)),
        out_shape=jax.ShapeDtypeStruct((B, Po, 2 * C), jnp.float32),
        scratch_shapes=[pltpu.VMEM((H + 2, W + 2, pad_c), jnp.float32)],
        compiler_params=_COMPILER_PARAMS,
    )(*ops)

    # channel_shuffle(groups=2) + NHWC->NCHW folded into ONE transpose pass:
    # kernel channel order is [left(C) | right(C)]; shuffled order is
    # [L0, R0, L1, R1, ...] which is exactly (C, 2)-major on the channel axis.
    out = out_flat.reshape(B, Ho, Wo, 2, C)
    out = jnp.transpose(out, (0, 4, 3, 1, 2)).reshape(B, 2 * C, Ho, Wo)
    return out


# --------------------------------------------------------------------------
# Deterministic parameter construction (torch-shaped) + kernel-form conversion
# --------------------------------------------------------------------------

_BN_EPS = 1e-5


def _bn_params(key, c):
    k1, k2, k3, k4 = jax.random.split(key, 4)
    gamma = 1.0 + 0.1 * jax.random.normal(k1, (c,), jnp.float32)
    beta = 0.1 * jax.random.normal(k2, (c,), jnp.float32)
    mean = 0.1 * jax.random.normal(k3, (c,), jnp.float32)
    var = jax.random.uniform(k4, (c,), jnp.float32, 0.5, 1.5)
    scale = gamma / jnp.sqrt(var + _BN_EPS)
    bias = beta - mean * scale
    return scale, bias


def make_base_branch_params(key, cin, c):
    k = jax.random.split(key, 6)
    w1 = 0.3 * jax.random.normal(k[0], (c, cin, 1, 1), jnp.float32)
    s1, b1 = _bn_params(k[1], c)
    wd = 0.3 * jax.random.normal(k[2], (c, 1, 3, 3), jnp.float32)
    s2, b2 = _bn_params(k[3], c)
    w3 = 0.3 * jax.random.normal(k[4], (c, c, 1, 1), jnp.float32)
    s3, b3 = _bn_params(k[5], c)
    return dict(w1=w1, s1=s1, b1=b1, wd=wd, s2=s2, b2=b2, w3=w3, s3=s3, b3=b3)


def make_left_branch_params(key, cin, c):
    k = jax.random.split(key, 4)
    wd = 0.3 * jax.random.normal(k[0], (cin, 1, 3, 3), jnp.float32)
    s1, b1 = _bn_params(k[1], cin)
    w1 = 0.3 * jax.random.normal(k[2], (c, cin, 1, 1), jnp.float32)
    s2, b2 = _bn_params(k[3], c)
    return dict(wd=wd, s1=s1, b1=b1, w1=w1, s2=s2, b2=b2)


def _kernel_form_base(p):
    """Base (right) branch: bf16 1x1 weights, f32 taps, packed BN (6, C)."""
    c = p["w1"].shape[0]
    return dict(
        w1=jnp.transpose(p["w1"][:, :, 0, 0], (1, 0)).astype(jnp.bfloat16),
        wd=jnp.transpose(p["wd"][:, 0], (1, 2, 0)).reshape(9, c),
        w3=jnp.transpose(p["w3"][:, :, 0, 0], (1, 0)).astype(jnp.bfloat16),
        sb=jnp.stack([p["s1"], p["b1"], p["s2"], p["b2"], p["s3"], p["b3"]],
                     axis=0),
    )


def _kernel_form_left(p):
    """Left branch: f32 taps, bf16 1x1 weight, packed BN (2, Cin) + (2, C)."""
    cin = p["wd"].shape[0]
    return dict(
        wd=jnp.transpose(p["wd"][:, 0], (1, 2, 0)).reshape(9, cin),
        sb_in=jnp.stack([p["s1"], p["b1"]], axis=0),
        w1=jnp.transpose(p["w1"][:, :, 0, 0], (1, 0)).astype(jnp.bfloat16),
        sb_out=jnp.stack([p["s2"], p["b2"]], axis=0),
    )


# --------------------------------------------------------------------------
# Pure-JAX (lax.conv) reference mirroring the PyTorch forward, for validation
# (1x1 convs use bf16 operands / f32 accumulate, matching the kernel's MXU use)
# --------------------------------------------------------------------------

def channel_shuffle(x, groups):
    B, C, H, W = x.shape
    x = x.reshape(B, groups, C // groups, H, W)
    x = jnp.transpose(x, (0, 2, 1, 3, 4))
    return x.reshape(B, C, H, W)


def _conv1x1_ref(x, w):
    return lax.conv_general_dilated(
        x.astype(jnp.bfloat16), w.astype(jnp.bfloat16), (1, 1), "VALID",
        dimension_numbers=("NCHW", "OIHW", "NCHW"),
        preferred_element_type=jnp.float32)


def _dwconv3x3_ref(x, w, stride):
    c = x.shape[1]
    return lax.conv_general_dilated(x, w, (stride, stride), [(1, 1), (1, 1)],
                                    dimension_numbers=("NCHW", "OIHW", "NCHW"),
                                    feature_group_count=c)


def _bn_ref(x, s, b):
    return x * s[None, :, None, None] + b[None, :, None, None]


def _base_branch_ref(x, p, stride):
    h = jnp.maximum(_bn_ref(_conv1x1_ref(x, p["w1"]), p["s1"], p["b1"]), 0.0)
    h = _bn_ref(_dwconv3x3_ref(h, p["wd"], stride), p["s2"], p["b2"])
    h = _bn_ref(_conv1x1_ref(h, p["w3"]), p["s3"], p["b3"])
    return jnp.maximum(h, 0.0)


def _left_branch_ref(x, p, stride):
    h = _bn_ref(_dwconv3x3_ref(x, p["wd"], stride), p["s1"], p["b1"])
    h = _bn_ref(_conv1x1_ref(h, p["w1"]), p["s2"], p["b2"])
    return jnp.maximum(h, 0.0)


def reference_forward_bm1(x, p2):
    c = x.shape[1] // 2
    out = jnp.concatenate([x[:, :c], _base_branch_ref(x[:, c:], p2, 1)], axis=1)
    return channel_shuffle(out, 2)


def reference_forward_bm2(x, pleft, pright, stride):
    out = jnp.concatenate([_left_branch_ref(x, pleft, stride),
                           _base_branch_ref(x, pright, stride)], axis=1)
    return channel_shuffle(out, 2)


# --------------------------------------------------------------------------

if __name__ == "__main__":
    key = jax.random.PRNGKey(0)
    kx1, kx2, kp1, kp2l, kp2r = jax.random.split(key, 5)

    TOL = dict(atol=1e-2, rtol=1e-2)   # bf16 MXU operands in kernel & reference

    # ---- benchmodel = 1, stride = 1 (split / process / concat / shuffle) ----
    B, inp, oup, H, W = 2, 8, 8, 16, 16
    oup_inc = oup // 2
    x = jax.random.normal(kx1, (B, inp, H, W), jnp.float32)
    p2 = make_base_branch_params(kp1, oup_inc, oup_inc)
    params1 = {"banch2": _kernel_form_base(p2)}

    out1 = jax.block_until_ready(
        edgecrnn_residual_forward(x, params1, benchmodel=1, stride=1))
    ref1 = reference_forward_bm1(x, p2)
    assert out1.shape == (B, oup, H, W)
    assert jnp.allclose(out1, ref1, **TOL), "benchmodel=1 mismatch"

    # ---- benchmodel = 2, stride = 2 (fused branches, strided subsample) -----
    B2, inp2, oup2, H2, W2 = 2, 4, 8, 16, 16
    oi2 = oup2 // 2
    x2 = jax.random.normal(kx2, (B2, inp2, H2, W2), jnp.float32)
    lp = make_left_branch_params(kp2l, inp2, oi2)
    rp = make_base_branch_params(kp2r, inp2, oi2)
    params2 = {"banch1": _kernel_form_left(lp), "banch2": _kernel_form_base(rp)}

    out2 = jax.block_until_ready(
        edgecrnn_residual_forward(x2, params2, benchmodel=2, stride=2))
    ref2 = reference_forward_bm2(x2, lp, rp, stride=2)
    assert out2.shape == (B2, oup2, H2 // 2, W2 // 2)
    assert jnp.allclose(out2, ref2, **TOL), "benchmodel=2 s2 mismatch"

    # ---- benchmodel = 2, stride = 1 (fused branches, no subsample path) -----
    out3 = jax.block_until_ready(
        edgecrnn_residual_forward(x2, params2, benchmodel=2, stride=1))
    ref3 = reference_forward_bm2(x2, lp, rp, stride=1)
    assert out3.shape == (B2, oup2, H2, W2)
    assert jnp.allclose(out3, ref3, **TOL), "benchmodel=2 s1 mismatch"

    print("KERNEL_OK")
</pallas_src>

<mosaic_0001>
module attributes {stable_mosaic.version = 11 : i64} {
  func.func @_split_block_kernel(%arg0: i32, %arg1: memref<1x16x16x8xf32, #tpu.memory_space<vmem>>, %arg2: memref<4x4xbf16, #tpu.memory_space<vmem>>, %arg3: memref<9x4xf32, #tpu.memory_space<vmem>>, %arg4: memref<4x4xbf16, #tpu.memory_space<vmem>>, %arg5: memref<6x4xf32, #tpu.memory_space<vmem>>, %arg6: memref<1x256x8xf32, #tpu.memory_space<vmem>>, %arg7: memref<18x18x4xf32, #tpu.memory_space<vmem>>) attributes {dimension_semantics = [#tpu.dimension_semantics<parallel>], iteration_bounds = array<i64: 2>, scalar_prefetch = 0 : i64, scratch_operands = 1 : i64, tpu.core_type = #tpu.core_type<tc>, window_params = [{transform_indices = @transform_0, window_bounds = array<i64: 1, 16, 16, 8>}, {pipeline_mode = #tpu.pipeline_mode<synchronous>, transform_indices = @transform_1, window_bounds = array<i64: 4, 4>}, {pipeline_mode = #tpu.pipeline_mode<synchronous>, transform_indices = @transform_2, window_bounds = array<i64: 9, 4>}, {pipeline_mode = #tpu.pipeline_mode<synchronous>, transform_indices = @transform_3, window_bounds = array<i64: 4, 4>}, {pipeline_mode = #tpu.pipeline_mode<synchronous>, transform_indices = @transform_4, window_bounds = array<i64: 6, 4>}, {transform_indices = @transform_5, window_bounds = array<i64: 1, 256, 8>}]} {
    %c0 = arith.constant 0 : index
    %c0_0 = arith.constant 0 : index
    %c0_1 = arith.constant 0 : index
    %c0_2 = arith.constant 0 : index
    %0 = vector.load %arg1[%c0, %c0_0, %c0_1, %c0_2] : memref<1x16x16x8xf32, #tpu.memory_space<vmem>>, vector<1x16x16x8xf32>
    %1 = vector.shape_cast %0 : vector<1x16x16x8xf32> to vector<16x16x8xf32>
    %2 = vector.extract_strided_slice %1 {offsets = [0, 0, 0], sizes = [16, 16, 4], strides = [1, 1, 1]} : vector<16x16x8xf32> to vector<16x16x4xf32>
    %3 = vector.shape_cast %2 : vector<16x16x4xf32> to vector<256x4xf32>
    %4 = vector.extract_strided_slice %1 {offsets = [0, 0, 4], sizes = [16, 16, 4], strides = [1, 1, 1]} : vector<16x16x8xf32> to vector<16x16x4xf32>
    %5 = vector.shape_cast %4 : vector<16x16x4xf32> to vector<256x4xf32>
    %6 = arith.truncf %5 : vector<256x4xf32> to vector<256x4xbf16>
    %c0_3 = arith.constant 0 : index
    %c0_4 = arith.constant 0 : index
    %7 = vector.load %arg2[%c0_3, %c0_4] : memref<4x4xbf16, #tpu.memory_space<vmem>>, vector<4x4xbf16>
    %cst = arith.constant dense<0.000000e+00> : vector<256x4xf32>
    %8 = tpu.matmul %6, %7, %cst {dimension_numbers = #tpu.dot_dimension_numbers<[1], [0], [0], [1], [0, 0, 1, 1], [], []>} : vector<256x4xbf16>, vector<4x4xbf16>, vector<256x4xf32> -> vector<256x4xf32>
    %c0_5 = arith.constant 0 : index
    %c0_6 = arith.constant 0 : index
    %9 = vector.load %arg5[%c0_5, %c0_6] : memref<6x4xf32, #tpu.memory_space<vmem>>, vector<1x4xf32>
    %10 = vector.broadcast %9 : vector<1x4xf32> to vector<256x4xf32>
    %11 = arith.mulf %8, %10 : vector<256x4xf32>
    %c1 = arith.constant 1 : index
    %c0_7 = arith.constant 0 : index
    %12 = vector.load %arg5[%c1, %c0_7] : memref<6x4xf32, #tpu.memory_space<vmem>>, vector<1x4xf32>
    %13 = vector.broadcast %12 : vector<1x4xf32> to vector<256x4xf32>
    %14 = arith.addf %11, %13 : vector<256x4xf32>
    %cst_8 = arith.constant 0.000000e+00 : f32
    %15 = vector.broadcast %cst_8 : f32 to vector<256x4xf32>
    %16 = arith.maximumf %14, %15 : vector<256x4xf32>
    %17 = vector.shape_cast %16 : vector<256x4xf32> to vector<16x16x4xf32>
    %cst_9 = arith.constant 0.000000e+00 : f32
    %18 = vector.broadcast %cst_9 : f32 to vector<1x18x4xf32>
    %cst_10 = arith.constant 0.000000e+00 : f32
    %19 = vector.broadcast %cst_10 : f32 to vector<16x1x4xf32>
    %c0_11 = arith.constant 0 : index
    %c0_12 = arith.constant 0 : index
    %c0_13 = arith.constant 0 : index
    %20 = vector.load %arg7[%c0_11, %c0_12, %c0_13] : memref<18x18x4xf32, #tpu.memory_space<vmem>>, vector<1x18x4xf32>
    tpu.vector_store %arg7[%c0_11, %c0_12, %c0_13], %18 {strides = array<i32>} : memref<18x18x4xf32, #tpu.memory_space<vmem>>, vector<1x18x4xf32>,
    %c17 = arith.constant 17 : index
    %c0_14 = arith.constant 0 : index
    %c0_15 = arith.constant 0 : index
    %21 = vector.load %arg7[%c17, %c0_14, %c0_15] : memref<18x18x4xf32, #tpu.memory_space<vmem>>, vector<1x18x4xf32>
    tpu.vector_store %arg7[%c17, %c0_14, %c0_15], %18 {strides = array<i32>} : memref<18x18x4xf32, #tpu.memory_space<vmem>>, vector<1x18x4xf32>,
    %c1_16 = arith.constant 1 : index
    %c0_17 = arith.constant 0 : index
    %c0_18 = arith.constant 0 : index
    %22 = vector.load %arg7[%c1_16, %c0_17, %c0_18] : memref<18x18x4xf32, #tpu.memory_space<vmem>>, vector<16x1x4xf32>
    tpu.vector_store %arg7[%c1_16, %c0_17, %c0_18], %19 {strides = array<i32>} : memref<18x18x4xf32, #tpu.memory_space<vmem>>, vector<16x1x4xf32>,
    %c1_19 = arith.constant 1 : index
    %c17_20 = arith.constant 17 : index
    %c0_21 = arith.constant 0 : index
    %23 = vector.load %arg7[%c1_19, %c17_20, %c0_21] : memref<18x18x4xf32, #tpu.memory_space<vmem>>, vector<16x1x4xf32>
    tpu.vector_store %arg7[%c1_19, %c17_20, %c0_21], %19 {strides = array<i32>} : memref<18x18x4xf32, #tpu.memory_space<vmem>>, vector<16x1x4xf32>,
    %c1_22 = arith.constant 1 : index
    %c1_23 = arith.constant 1 : index
    %c0_24 = arith.constant 0 : index
    %24 = vector.load %arg7[%c1_22, %c1_23, %c0_24] : memref<18x18x4xf32, #tpu.memory_space<vmem>>, vector<16x16x4xf32>
    tpu.vector_store %arg7[%c1_22, %c1_23, %c0_24], %17 {strides = array<i32>} : memref<18x18x4xf32, #tpu.memory_space<vmem>>, vector<16x16x4xf32>,
    %c0_25 = arith.constant 0 : index
    %c0_26 = arith.constant 0 : index
    %25 = vector.load %arg3[%c0_25, %c0_26] : memref<9x4xf32, #tpu.memory_space<vmem>>, vector<9x4xf32>
    %26 = vector.extract_strided_slice %25 {offsets = [0, 0], sizes = [1, 4], strides = [1, 1]} : vector<9x4xf32> to vector<1x4xf32>
    %27 = vector.shape_cast %26 : vector<1x4xf32> to vector<1x1x4xf32>
    %28 = vector.extract_strided_slice %25 {offsets = [1, 0], sizes = [1, 4], strides = [1, 1]} : vector<9x4xf32> to vector<1x4xf32>
    %29 = vector.shape_cast %28 : vector<1x4xf32> to vector<1x1x4xf32>
    %30 = vector.extract_strided_slice %25 {offsets = [2, 0], sizes = [1, 4], strides = [1, 1]} : vector<9x4xf32> to vector<1x4xf32>
    %31 = vector.shape_cast %30 : vector<1x4xf32> to vector<1x1x4xf32>
    %32 = vector.extract_strided_slice %25 {offsets = [3, 0], sizes = [1, 4], strides = [1, 1]} : vector<9x4xf32> to vector<1x4xf32>
    %33 = vector.shape_cast %32 : vector<1x4xf32> to vector<1x1x4xf32>
    %34 = vector.extract_strided_slice %25 {offsets = [4, 0], sizes = [1, 4], strides = [1, 1]} : vector<9x4xf32> to vector<1x4xf32>
    %35 = vector.shape_cast %34 : vector<1x4xf32> to vector<1x1x4xf32>
    %36 = vector.extract_strided_slice %25 {offsets = [5, 0], sizes = [1, 4], strides = [1, 1]} : vector<9x4xf32> to vector<1x4xf32>
    %37 = vector.shape_cast %36 : vector<1x4xf32> to vector<1x1x4xf32>
    %38 = vector.extract_strided_slice %25 {offsets = [6, 0], sizes = [1, 4], strides = [1, 1]} : vector<9x4xf32> to vector<1x4xf32>
    %39 = vector.shape_cast %38 : vector<1x4xf32> to vector<1x1x4xf32>
    %40 = vector.extract_strided_slice %25 {offsets = [7, 0], sizes = [1, 4], strides = [1, 1]} : vector<9x4xf32> to vector<1x4xf32>
    %41 = vector.shape_cast %40 : vector<1x4xf32> to vector<1x1x4xf32>
    %42 = vector.extract_strided_slice %25 {offsets = [8, 0], sizes = [1, 4], strides = [1, 1]} : vector<9x4xf32> to vector<1x4xf32>
    %43 = vector.shape_cast %42 : vector<1x4xf32> to vector<1x1x4xf32>
    %cst_27 = arith.constant 0.000000e+00 : f32
    %44 = vector.broadcast %cst_27 : f32 to vector<16x16x4xf32>
    %c0_28 = arith.constant 0 : index
    %c0_29 = arith.constant 0 : index
    %c0_30 = arith.constant 0 : index
    %45 = vector.load %arg7[%c0_28, %c0_29, %c0_30] : memref<18x18x4xf32, #tpu.memory_space<vmem>>, vector<16x16x4xf32>
    %46 = vector.broadcast %27 : vector<1x1x4xf32> to vector<16x16x4xf32>
    %47 = arith.mulf %45, %46 : vector<16x16x4xf32>
    %48 = arith.addf %44, %47 : vector<16x16x4xf32>
    %c0_31 = arith.constant 0 : index
    %c1_32 = arith.constant 1 : index
    %c0_33 = arith.constant 0 : index
    %49 = vector.load %arg7[%c0_31, %c1_32, %c0_33] : memref<18x18x4xf32, #tpu.memory_space<vmem>>, vector<16x16x4xf32>
    %50 = vector.broadcast %29 : vector<1x1x4xf32> to vector<16x16x4xf32>
    %51 = arith.mulf %49, %50 : vector<16x16x4xf32>
    %52 = arith.addf %48, %51 : vector<16x16x4xf32>
    %c0_34 = arith.constant 0 : index
    %c2 = arith.constant 2 : index
    %c0_35 = arith.constant 0 : index
    %53 = vector.load %arg7[%c0_34, %c2, %c0_35] : memref<18x18x4xf32, #tpu.memory_space<vmem>>, vector<16x16x4xf32>
    %54 = vector.broadcast %31 : vector<1x1x4xf32> to vector<16x16x4xf32>
    %55 = arith.mulf %53, %54 : vector<16x16x4xf32>
    %56 = arith.addf %52, %55 : vector<16x16x4xf32>
    %c1_36 = arith.constant 1 : index
    %c0_37 = arith.constant 0 : index
    %c0_38 = arith.constant 0 : index
    %57 = vector.load %arg7[%c1_36, %c0_37, %c0_38] : memref<18x18x4xf32, #tpu.memory_space<vmem>>, vector<16x16x4xf32>
    %58 = vector.broadcast %33 : vector<1x1x4xf32> to vector<16x16x4xf32>
    %59 = arith.mulf %57, %58 : vector<16x16x4xf32>
    %60 = arith.addf %56, %59 : vector<16x16x4xf32>
    %c1_39 = arith.constant 1 : index
    %c1_40 = arith.constant 1 : index
    %c0_41 = arith.constant 0 : index
    %61 = vector.load %arg7[%c1_39, %c1_40, %c0_41] : memref<18x18x4xf32, #tpu.memory_space<vmem>>, vector<16x16x4xf32>
    %62 = vector.broadcast %35 : vector<1x1x4xf32> to vector<16x16x4xf32>
    %63 = arith.mulf %61, %62 : vector<16x16x4xf32>
    %64 = arith.addf %60, %63 : vector<16x16x4xf32>
    %c1_42 = arith.constant 1 : index
    %c2_43 = arith.constant 2 : index
    %c0_44 = arith.constant 0 : index
    %65 = vector.load %arg7[%c1_42, %c2_43, %c0_44] : memref<18x18x4xf32, #tpu.memory_space<vmem>>, vector<16x16x4xf32>
    %66 = vector.broadcast %37 : vector<1x1x4xf32> to vector<16x16x4xf32>
    %67 = arith.mulf %65, %66 : vector<16x16x4xf32>
    %68 = arith.addf %64, %67 : vector<16x16x4xf32>
    %c2_45 = arith.constant 2 : index
    %c0_46 = arith.constant 0 : index
    %c0_47 = arith.constant 0 : index
    %69 = vector.load %arg7[%c2_45, %c0_46, %c0_47] : memref<18x18x4xf32, #tpu.memory_space<vmem>>, vector<16x16x4xf32>
    %70 = vector.broadcast %39 : vector<1x1x4xf32> to vector<16x16x4xf32>
    %71 = arith.mulf %69, %70 : vector<16x16x4xf32>
    %72 = arith.addf %68, %71 : vector<16x16x4xf32>
    %c2_48 = arith.constant 2 : index
    %c1_49 = arith.constant 1 : index
    %c0_50 = arith.constant 0 : index
    %73 = vector.load %arg7[%c2_48, %c1_49, %c0_50] : memref<18x18x4xf32, #tpu.memory_space<vmem>>, vector<16x16x4xf32>
    %74 = vector.broadcast %41 : vector<1x1x4xf32> to vector<16x16x4xf32>
    %75 = arith.mulf %73, %74 : vector<16x16x4xf32>
    %76 = arith.addf %72, %75 : vector<16x16x4xf32>
    %c2_51 = arith.constant 2 : index
    %c2_52 = arith.constant 2 : index
    %c0_53 = arith.constant 0 : index
    %77 = vector.load %arg7[%c2_51, %c2_52, %c0_53] : memref<18x18x4xf32, #tpu.memory_space<vmem>>, vector<16x16x4xf32>
    %78 = vector.broadcast %43 : vector<1x1x4xf32> to vector<16x16x4xf32>
    %79 = arith.mulf %77, %78 : vector<16x16x4xf32>
    %80 = arith.addf %76, %79 : vector<16x16x4xf32>
    %81 = vector.shape_cast %80 : vector<16x16x4xf32> to vector<256x4xf32>
    %c2_54 = arith.constant 2 : index
    %c0_55 = arith.constant 0 : index
    %82 = vector.load %arg5[%c2_54, %c0_55] : memref<6x4xf32, #tpu.memory_space<vmem>>, vector<1x4xf32>
    %83 = vector.broadcast %82 : vector<1x4xf32> to vector<256x4xf32>
    %84 = arith.mulf %81, %83 : vector<256x4xf32>
    %c3 = arith.constant 3 : index
    %c0_56 = arith.constant 0 : index
    %85 = vector.load %arg5[%c3, %c0_56] : memref<6x4xf32, #tpu.memory_space<vmem>>, vector<1x4xf32>
    %86 = vector.broadcast %85 : vector<1x4xf32> to vector<256x4xf32>
    %87 = arith.addf %84, %86 : vector<256x4xf32>
    %88 = arith.truncf %87 : vector<256x4xf32> to vector<256x4xbf16>
    %c0_57 = arith.constant 0 : index
    %c0_58 = arith.constant 0 : index
    %89 = vector.load %arg4[%c0_57, %c0_58] : memref<4x4xbf16, #tpu.memory_space<vmem>>, vector<4x4xbf16>
    %cst_59 = arith.constant dense<0.000000e+00> : vector<256x4xf32>
    %90 = tpu.matmul %88, %89, %cst_59 {dimension_numbers = #tpu.dot_dimension_numbers<[1], [0], [0], [1], [0, 0, 1, 1], [], []>} : vector<256x4xbf16>, vector<4x4xbf16>, vector<256x4xf32> -> vector<256x4xf32>
    %c4 = arith.constant 4 : index
    %c0_60 = arith.constant 0 : index
    %91 = vector.load %arg5[%c4, %c0_60] : memref<6x4xf32, #tpu.memory_space<vmem>>, vector<1x4xf32>
    %92 = vector.broadcast %91 : vector<1x4xf32> to vector<256x4xf32>
    %93 = arith.mulf %90, %92 : vector<256x4xf32>
    %c5 = arith.constant 5 : index
    %c0_61 = arith.constant 0 : index
    %94 = vector.load %arg5[%c5, %c0_61] : memref<6x4xf32, #tpu.memory_space<vmem>>, vector<1x4xf32>
    %95 = vector.broadcast %94 : vector<1x4xf32> to vector<256x4xf32>
    %96 = arith.addf %93, %95 : vector<256x4xf32>
    %cst_62 = arith.constant 0.000000e+00 : f32
    %97 = vector.broadcast %cst_62 : f32 to vector<256x4xf32>
    %98 = arith.maximumf %96, %97 : vector<256x4xf32>
    %c0_63 = arith.constant 0 : index
    %c0_64 = arith.constant 0 : index
    %c0_65 = arith.constant 0 : index
    %99 = vector.load %arg6[%c0_63, %c0_64, %c0_65] : memref<1x256x8xf32, #tpu.memory_space<vmem>>, vector<1x256x4xf32>
    %100 = vector.shape_cast %99 : vector<1x256x4xf32> to vector<256x4xf32>
    %101 = vector.shape_cast %3 : vector<256x4xf32> to vector<1x256x4xf32>
    tpu.vector_store %arg6[%c0_63, %c0_64, %c0_65], %101 {strides = array<i32>} : memref<1x256x8xf32, #tpu.memory_space<vmem>>, vector<1x256x4xf32>,
    %c0_66 = arith.constant 0 : index
    %c0_67 = arith.constant 0 : index
    %c4_68 = arith.constant 4 : index
    %102 = vector.load %arg6[%c0_66, %c0_67, %c4_68] : memref<1x256x8xf32, #tpu.memory_space<vmem>>, vector<1x256x4xf32>
    %103 = vector.shape_cast %102 : vector<1x256x4xf32> to vector<256x4xf32>
    %104 = vector.shape_cast %98 : vector<256x4xf32> to vector<1x256x4xf32>
    tpu.vector_store %arg6[%c0_66, %c0_67, %c4_68], %104 {strides = array<i32>} : memref<1x256x8xf32, #tpu.memory_space<vmem>>, vector<1x256x4xf32>,
    return
  }
  func.func @transform_0(%arg0: i32) -> (i32, i32, i32, i32) {
    %c0_i32 = arith.constant 0 : i32
    %c0_i32_0 = arith.constant 0 : i32
    %c0_i32_1 = arith.constant 0 : i32
    %c0_i32_2 = arith.constant 0 : i32
    return %arg0, %c0_i32, %c0_i32_0, %c0_i32_1 : i32, i32, i32, i32
  }
  func.func @transform_1(%arg0: i32) -> (i32, i32) {
    %c0_i32 = arith.constant 0 : i32
    %c0_i32_0 = arith.constant 0 : i32
    %c0_i32_1 = arith.constant 0 : i32
    return %c0_i32, %c0_i32_0 : i32, i32
  }
  func.func @transform_2(%arg0: i32) -> (i32, i32) {
    %c0_i32 = arith.constant 0 : i32
    %c0_i32_0 = arith.constant 0 : i32
    %c0_i32_1 = arith.constant 0 : i32
    return %c0_i32, %c0_i32_0 : i32, i32
  }
  func.func @transform_3(%arg0: i32) -> (i32, i32) {
    %c0_i32 = arith.constant 0 : i32
    %c0_i32_0 = arith.constant 0 : i32
    %c0_i32_1 = arith.constant 0 : i32
    return %c0_i32, %c0_i32_0 : i32, i32
  }
  func.func @transform_4(%arg0: i32) -> (i32, i32) {
    %c0_i32 = arith.constant 0 : i32
    %c0_i32_0 = arith.constant 0 : i32
    %c0_i32_1 = arith.constant 0 : i32
    return %c0_i32, %c0_i32_0 : i32, i32
  }
  func.func @transform_5(%arg0: i32) -> (i32, i32, i32) {
    %c0_i32 = arith.constant 0 : i32
    %c0_i32_0 = arith.constant 0 : i32
    %c0_i32_1 = arith.constant 0 : i32
    return %arg0, %c0_i32, %c0_i32_0 : i32, i32, i32
  }
}

</mosaic_0001>

<bundles_post_ra>
// kernel: tpu_custom_call.1
= control target key start
LH: loop header
LB: loop body
LE: loop exit
PB: predicated region body
PF: predicated region fallthrough
CT: control target
= control target key end

     0   :  { %s2488_s18 = smov 0   ;;  %s3732_s0 = inlined_call_operand.vmem [shape: f32[2,16,16,8], index: 0, kind: input, shape index: {}]   ;;  %s3733_s1 = inlined_call_operand.vmem [shape: bf16[4,4], index: 1, kind: input, shape index: {}]   ;;  %s3734_s2 = inlined_call_operand.vmem [shape: f32[9,4], index: 2, kind: input, shape index: {}]   ;;  %s3735_s3 = inlined_call_operand.vmem [shape: bf16[4,4], index: 3, kind: input, shape index: {}]   ;;  %s3736_s4 = inlined_call_operand.vmem [shape: f32[6,4], index: 4, kind: input, shape index: {}]   ;;  %s3737_s5 = inlined_call_operand.vmem [shape: f32[2,256,8], index: 5, kind: output, shape index: {}]  }
   0x1 LB: > { %s2277_s19 = sadd.s32 4294967295, %s2453_s18   ;;  %p2281_p0 = scmp.ge.s32.totalorder %s2453_s18, 1  ;;  %s2453_s18 = sphi %s2488_s18, %s15_s18  }
   0x2   : > { %p187_p1 = scmp.lt.s32.totalorder %s2453_s18, 3 }
   0x4   : > { %p188_p2 = pnand %p2281_p0, %p187_p1 }
   0x5   : > { %p215_p3 = scmp.lt.s32.totalorder (!%p188_p2), %s2277_s19, 1  ;;  %s2455_s29 = smov (!%p188_p2), 124  }
   0x6   : > { %191 = sbr.rel (%p188_p2) target bundleno = 856 (0x358), region = 40  ;;  %s2457_s6 = smov (!%p188_p2), 4  }
   0xb   : > { %v274_v0 = vld [vmem:[%s3733_s1] sm:$0x3]  ;;  %vm372_vm0 = vcmask 1041408   ;;  %s3739_s19 = smov (!%p215_p3, %s2277_s19), 1  ;;  %vm323_vm1 = vcmask 31744   ;;  %vm652_vm2 = vcmask 24576  }
   0xc   : > { %2431 = vmatprep.subr.msk.bf16.mxu0 %vm372_vm0, %v274_v0  ;;  %v374_v1 = vsel %vm372_vm0, %v274_v0, 0  ;;  %s2327_s22 = sshll.u32 %s3739_s19, 8  ;;  %vm645_vm3 = vcmask 25600   ;;  %vm2189_vm4 = vcmask 64544  }
   0xd   : > { %2364 = vmatpush3.bf16.msra.mxu0 %v374_v1  ;;  %s2504_s25 = scalar_lea.vmem %s3732_s0, %s2327_s22  ;;  %s2509_s28 = scalar_lea.vmem %s3737_s5, %s2327_s22 }
   0xe   : > { %v226_v2 = vld [vmem:[%s2504_s25] sm:$0xff]  ;;  %v227_v3 = vld [vmem:[%s2504_s25 + $0x8] sm:$0xff]  ;;  %v228_v4 = vld [vmem:[%s2504_s25 + $0x10] sm:$0xff] }
   0xf   : > { %v258_v5 = vpack.c.bf16 %v227_v3, %v226_v2  ;;  %2029 = vst.msk [vmem:[%s2509_s28] sm:$0xff] %vm323_vm1, %v226_v2  ;;  %2030 = vst.msk [vmem:[%s2509_s28 + $0x8] sm:$0xff] %vm323_vm1, %v227_v3  ;;  %v229_v6 = vld [vmem:[%s2504_s25 + $0x18] sm:$0xff]  ;;  %v230_v7 = vld [vmem:[%s2504_s25 + $0x20] sm:$0xff]  ;;  %v2456_v2 = vmov 0.0  }
  0x10   : > { %2031 = vst.msk [vmem:[%s2509_s28 + $0x10] sm:$0xff] %vm323_vm1, %v228_v4  ;;  %v231_v8 = vld [vmem:[%s2504_s25 + $0x28] sm:$0xff]  ;;  %2032 = vst.msk [vmem:[%s2509_s28 + $0x18] sm:$0xff] %vm323_vm1, %v229_v6  ;;  %v232_v10 = vld [vmem:[%s2504_s25 + $0x30] sm:$0xff]  ;;  %v259_v13 = vpack.c.bf16 %v229_v6, %v228_v4 }
  0x11   : > { %v260_v9 = vpack.c.bf16 %v231_v8, %v230_v7  ;;  %2033 = vst.msk [vmem:[%s2509_s28 + $0x20] sm:$0xff] %vm323_vm1, %v230_v7  ;;  %2034 = vst.msk [vmem:[%s2509_s28 + $0x28] sm:$0xff] %vm323_vm1, %v231_v8  ;;  %v233_v11 = vld [vmem:[%s2504_s25 + $0x38] sm:$0xff]  ;;  %v234_v12 = vld [vmem:[%s2504_s25 + $0x40] sm:$0xff] }
  0x12   : > { %291 = vrot.lane.b32.xlu0 %v258_v5, %s2455_s29  ;;  %2035 = vst.msk [vmem:[%s2509_s28 + $0x30] sm:$0xff] %vm323_vm1, %v232_v10  ;;  %2036 = vst.msk [vmem:[%s2509_s28 + $0x38] sm:$0xff] %vm323_vm1, %v233_v11  ;;  %v235_v14 = vld [vmem:[%s2504_s25 + $0x48] sm:$0xff]  ;;  %v261_v17 = vpack.c.bf16 %v233_v11, %v232_v10  ;;  %v751_v5 = vlaneseq }
  0x13   : > { %2037 = vst.msk [vmem:[%s2509_s28 + $0x40] sm:$0xff] %vm323_vm1, %v234_v12  ;;  %v236_v15 = vld [vmem:[%s2504_s25 + $0x50] sm:$0xff]  ;;  %v237_v16 = vld [vmem:[%s2504_s25 + $0x58] sm:$0xff]  ;;  %295 = vrot.lane.b32.xlu1 %v260_v9, %s2455_s29  ;;  %v262_v27 = vpack.c.bf16 %v235_v14, %v234_v12  ;;  %643 = vst.msk [vmem:[#allocation2] sm:$0xff] %vm323_vm1, %v2456_v2 }
  0x14   : > { %2038 = vst.msk [vmem:[%s2509_s28 + $0x48] sm:$0xff] %vm323_vm1, %v235_v14  ;;  %2039 = vst.msk [vmem:[%s2509_s28 + $0x50] sm:$0xff] %vm323_vm1, %v236_v15  ;;  %v238_v18 = vld [vmem:[%s2504_s25 + $0x60] sm:$0xff]  ;;  %v239_v19 = vld [vmem:[%s2504_s25 + $0x68] sm:$0xff]  ;;  %v263_v31 = vpack.c.bf16 %v237_v16, %v236_v15  ;;  %v2680_v6 = vshrl.u32 %v751_v5, 7 }
  0x15   : > { %2040 = vst.msk [vmem:[%s2509_s28 + $0x58] sm:$0xff] %vm323_vm1, %v237_v16  ;;  %v240_v20 = vld [vmem:[%s2504_s25 + $0x70] sm:$0xff]  ;;  %2041 = vst.msk [vmem:[%s2509_s28 + $0x60] sm:$0xff] %vm323_vm1, %v238_v18  ;;  %v241_v21 = vld [vmem:[%s2504_s25 + $0x78] sm:$0xff]  ;;  %v264_v40 = vpack.c.bf16 %v239_v19, %v238_v18 }
  0x16   : > { %2042 = vst.msk [vmem:[%s2509_s28 + $0x68] sm:$0xff] %vm323_vm1, %v239_v19  ;;  %2043 = vst.msk [vmem:[%s2509_s28 + $0x70] sm:$0xff] %vm323_vm1, %v240_v20  ;;  %v242_v22 = vld [vmem:[%s2504_s25 + $0x80] sm:$0xff]  ;;  %v243_v23 = vld [vmem:[%s2504_s25 + $0x88] sm:$0xff]  ;;  %v265_v41 = vpack.c.bf16 %v241_v21, %v240_v20  ;;  %v753_v7 = vsub.s32 0, %v2680_v6  ;;  %v853_v9 = vsub.s32 1, %v2680_v6 }
  0x17   : > { %2044 = vst.msk [vmem:[%s2509_s28 + $0x78] sm:$0xff] %vm323_vm1, %v241_v21  ;;  %2045 = vst.msk [vmem:[%s2509_s28 + $0x80] sm:$0xff] %vm323_vm1, %v242_v22  ;;  %v244_v24 = vld [vmem:[%s2504_s25 + $0x90] sm:$0xff]  ;;  %v245_v25 = vld [vmem:[%s2504_s25 + $0x98] sm:$0xff]  ;;  %v266_v42 = vpack.c.bf16 %v243_v23, %v242_v22  ;;  %v953_v19 = vsub.s32 2, %v2680_v6 }
  0x18   : > { %2046 = vst.msk [vmem:[%s2509_s28 + $0x88] sm:$0xff] %vm323_vm1, %v243_v23  ;;  %v246_v26 = vld [vmem:[%s2504_s25 + $0xa0] sm:$0xff]  ;;  %293 = vrot.lane.b32.xlu0 %v259_v13, %s2455_s29  ;;  %2047 = vst.msk [vmem:[%s2509_s28 + $0x90] sm:$0xff] %vm323_vm1, %v244_v24  ;;  %v267_v43 = vpack.c.bf16 %v245_v25, %v244_v24 }
  0x19   : > { %2048 = vst.msk [vmem:[%s2509_s28 + $0x98] sm:$0xff] %vm323_vm1, %v245_v25  ;;  %v247_v28 = vld [vmem:[%s2504_s25 + $0xa8] sm:$0xff]  ;;  %2049 = vst.msk [vmem:[%s2509_s28 + $0xa0] sm:$0xff] %vm323_vm1, %v246_v26  ;;  %v248_v29 = vld [vmem:[%s2504_s25 + $0xb0] sm:$0xff] }
  0x1a   : > { %v249_v30 = vld [vmem:[%s2504_s25 + $0xb8] sm:$0xff]  ;;  %297 = vrot.lane.b32.xlu1 %v261_v17, %s2455_s29  ;;  %2050 = vst.msk [vmem:[%s2509_s28 + $0xa8] sm:$0xff] %vm323_vm1, %v247_v28  ;;  %2051 = vst.msk [vmem:[%s2509_s28 + $0xb0] sm:$0xff] %vm323_vm1, %v248_v29  ;;  %v268_v44 = vpack.c.bf16 %v247_v28, %v246_v26  ;;  %v719_v15 = vld [vmem:[#allocation2] sm:$0xff] }
  0x1b   : > { %2052 = vst.msk [vmem:[%s2509_s28 + $0xb8] sm:$0xff] %vm323_vm1, %v249_v30  ;;  %v250_v32 = vld [vmem:[%s2504_s25 + $0xc0] sm:$0xff]  ;;  %v251_v33 = vld [vmem:[%s2504_s25 + $0xc8] sm:$0xff]  ;;  %v252_v34 = vld [vmem:[%s2504_s25 + $0xd0] sm:$0xff]  ;;  %v269_v45 = vpack.c.bf16 %v249_v30, %v248_v29 }
  0x1c   : > { %2053 = vst.msk [vmem:[%s2509_s28 + $0xc0] sm:$0xff] %vm323_vm1, %v250_v32  ;;  %2054 = vst.msk [vmem:[%s2509_s28 + $0xc8] sm:$0xff] %vm323_vm1, %v251_v33  ;;  %v253_v35 = vld [vmem:[%s2504_s25 + $0xd8] sm:$0xff]  ;;  %v254_v36 = vld [vmem:[%s2504_s25 + $0xe0] sm:$0xff]  ;;  %v270_v46 = vpack.c.bf16 %v251_v33, %v250_v32 }
  0x1d   : > { %2055 = vst.msk [vmem:[%s2509_s28 + $0xd0] sm:$0xff] %vm323_vm1, %v252_v34  ;;  %v255_v37 = vld [vmem:[%s2504_s25 + $0xe8] sm:$0xff]  ;;  %2056 = vst.msk [vmem:[%s2509_s28 + $0xd8] sm:$0xff] %vm323_vm1, %v253_v35  ;;  %v256_v38 = vld [vmem:[%s2504_s25 + $0xf0] sm:$0xff]  ;;  %v271_v47 = vpack.c.bf16 %v253_v35, %v252_v34 }
  0x1e   : > { %2057 = vst.msk [vmem:[%s2509_s28 + $0xe0] sm:$0xff] %vm323_vm1, %v254_v36  ;;  %2058 = vst.msk [vmem:[%s2509_s28 + $0xe8] sm:$0xff] %vm323_vm1, %v255_v37  ;;  %v257_v39 = vld [vmem:[%s2504_s25 + $0xf8] sm:$0xff]  ;;  %299 = vrot.lane.b32.xlu0 %v262_v27, %s2455_s29  ;;  %v272_v48 = vpack.c.bf16 %v255_v37, %v254_v36 }
  0x1f   : > { %2059 = vst.msk [vmem:[%s2509_s28 + $0xf0] sm:$0xff] %vm323_vm1, %v256_v38  ;;  %2060 = vst.msk [vmem:[%s2509_s28 + $0xf8] sm:$0xff] %vm323_vm1, %v257_v39  ;;  %301 = vrot.lane.b32.xlu1 %v263_v31, %s2455_s29  ;;  %v273_v49 = vpack.c.bf16 %v257_v39, %v256_v38  ;;  %v1710_v3 = vld [vmem:[%s3735_s3] sm:$0x3]  ;;  %v1354_v39 = vsub.s32 6, %v2680_v6 }
  0x20   : > { %644 = vst.msk [vmem:[#allocation2 + $0x8] sm:$0xff] %vm323_vm1, %v2456_v2  ;;  %648 = vst.msk [vmem:[#allocation2 + $0x198] sm:$0xff] %vm323_vm1, %v2456_v2  ;;  %2432 = vmatprep.subr.msk.bf16.mxu1 %vm372_vm0, %v1710_v3  ;;  %v1760_v4 = vsel %vm372_vm0, %v1710_v3, 0  ;;  %v2686_v8 = vld [vmem:[%s3734_s2] sm:$0xff] }
  0x21   : > { %649 = vst.msk [vmem:[#allocation2 + $0x1a0] sm:$0xff] %vm323_vm1, %v2456_v2  ;;  %2398 = vmatpush3.bf16.msra.mxu1 %v1760_v4  ;;  %v2692_v10 = vld [vmem:[%s3736_s4] ss:$0 sm:$0xff]  ;;  %v2697_v12 = vld [vmem:[%s3736_s4 + $0x1] ss:$0 sm:$0xff]  ;;  %v2700_v13 = vrot.slane %v2686_v8, %v753_v7  ;;  %v2704_v16 = vrot.slane %v2686_v8, %v853_v9  ;;  %v2716_v33 = vrot.slane %v2686_v8, %v953_v19 }
  0x22   : > { %303 = vrot.lane.b32.xlu0 %v264_v40, %s2455_s29  ;;  %653 = vst.msk [vmem:[#allocation2 + $0x18] sm:$0x1] %vm652_vm2, %v2456_v2  ;;  %654 = vst.msk [vmem:[#allocation2 + $0x30] sm:$0x1] %vm652_vm2, %v2456_v2 }
  0x23   : > { %305 = vrot.lane.b32.xlu1 %v265_v41, %s2455_s29  ;;  %669 = vst.msk [vmem:[#allocation2 + $0x29] sm:$0x1] %vm652_vm2, %v2456_v2  ;;  %670 = vst.msk [vmem:[#allocation2 + $0x41] sm:$0x1] %vm652_vm2, %v2456_v2  ;;  %v755_v25 = vmul.f32 %v2700_v13, %v719_v15  ;;  %v1053_v41 = vsub.s32 3, %v2680_v6 }
  0x24   : > { %655 = vst.msk [vmem:[#allocation2 + $0x48] sm:$0x1] %vm652_vm2, %v2456_v2  ;;  %656 = vst.msk [vmem:[#allocation2 + $0x60] sm:$0x1] %vm652_vm2, %v2456_v2 }
  0x25   : > { %657 = vst.msk [vmem:[#allocation2 + $0x78] sm:$0x1] %vm652_vm2, %v2456_v2  ;;  %658 = vst.msk [vmem:[#allocation2 + $0x90] sm:$0x1] %vm652_vm2, %v2456_v2 }
  0x26   : > { %307 = vrot.lane.b32.xlu0 %v266_v42, %s2455_s29  ;;  %659 = vst.msk [vmem:[#allocation2 + $0xa8] sm:$0x1] %vm652_vm2, %v2456_v2  ;;  %660 = vst.msk [vmem:[#allocation2 + $0xc0] sm:$0x1] %vm652_vm2, %v2456_v2  ;;  %v1153_v42 = vsub.s32 4, %v2680_v6 }
  0x27   : > { %309 = vrot.lane.b32.xlu1 %v267_v43, %s2455_s29  ;;  %661 = vst.msk [vmem:[#allocation2 + $0xd8] sm:$0x1] %vm652_vm2, %v2456_v2  ;;  %662 = vst.msk [vmem:[#allocation2 + $0xf0] sm:$0x1] %vm652_vm2, %v2456_v2  ;;  %v819_v18 = vld [vmem:[#allocation2 + $0x1] sm:$0xff]  ;;  %v1454_v43 = vsub.s32 7, %v2680_v6 }
  0x28   : > { %663 = vst.msk [vmem:[#allocation2 + $0x108] sm:$0x1] %vm652_vm2, %v2456_v2  ;;  %664 = vst.msk [vmem:[#allocation2 + $0x120] sm:$0x1] %vm652_vm2, %v2456_v2  ;;  %v720_v22 = vld [vmem:[#allocation2 + $0x8] sm:$0xff]  ;;  %v855_v29 = vmul.f32 %v2704_v16, %v819_v18 }
  0x29   : > { %665 = vst.msk [vmem:[#allocation2 + $0x138] sm:$0x1] %vm652_vm2, %v2456_v2  ;;  %666 = vst.msk [vmem:[#allocation2 + $0x150] sm:$0x1] %vm652_vm2, %v2456_v2  ;;  %v756_v31 = vmul.f32 %v2700_v13, %v720_v22  ;;  %v919_v37 = vld [vmem:[#allocation2 + $0x2] sm:$0xff] }
  0x2a   : > { %311 = vrot.lane.b32.xlu0 %v268_v44, %s2455_s29  ;;  %667 = vst.msk [vmem:[#allocation2 + $0x168] sm:$0x1] %vm652_vm2, %v2456_v2  ;;  %668 = vst.msk [vmem:[#allocation2 + $0x180] sm:$0x1] %vm652_vm2, %v2456_v2 }
  0x2b   : > { %313 = vrot.lane.b32.xlu1 %v269_v45, %s2455_s29  ;;  %671 = vst.msk [vmem:[#allocation2 + $0x59] sm:$0x1] %vm652_vm2, %v2456_v2  ;;  %672 = vst.msk [vmem:[#allocation2 + $0x71] sm:$0x1] %vm652_vm2, %v2456_v2 }
  0x2c   : > { %673 = vst.msk [vmem:[#allocation2 + $0x89] sm:$0x1] %vm652_vm2, %v2456_v2  ;;  %674 = vst.msk [vmem:[#allocation2 + $0xa1] sm:$0x1] %vm652_vm2, %v2456_v2 }
  0x2d   : > { %675 = vst.msk [vmem:[#allocation2 + $0xb9] sm:$0x1] %vm652_vm2, %v2456_v2  ;;  %676 = vst.msk [vmem:[#allocation2 + $0xd1] sm:$0x1] %vm652_vm2, %v2456_v2 }
  0x2e   : > { %315 = vrot.lane.b32.xlu0 %v270_v46, %s2455_s29  ;;  %677 = vst.msk [vmem:[#allocation2 + $0xe9] sm:$0x1] %vm652_vm2, %v2456_v2  ;;  %678 = vst.msk [vmem:[#allocation2 + $0x101] sm:$0x1] %vm652_vm2, %v2456_v2 }
  0x2f   : > { %317 = vrot.lane.b32.xlu1 %v271_v47, %s2455_s29  ;;  %679 = vst.msk [vmem:[#allocation2 + $0x119] sm:$0x1] %vm652_vm2, %v2456_v2  ;;  %680 = vst.msk [vmem:[#allocation2 + $0x131] sm:$0x1] %vm652_vm2, %v2456_v2  ;;  %v887_v47 = vadd.f32 %v855_v29, %v755_v25 }
  0x30   : > { %681 = vst.msk [vmem:[#allocation2 + $0x149] sm:$0x1] %vm652_vm2, %v2456_v2  ;;  %682 = vst.msk [vmem:[#allocation2 + $0x161] sm:$0x1] %vm652_vm2, %v2456_v2 }
  0x31   : > { %683 = vst.msk [vmem:[#allocation2 + $0x179] sm:$0x1] %vm652_vm2, %v2456_v2  ;;  %684 = vst.msk [vmem:[#allocation2 + $0x191] sm:$0x1] %vm652_vm2, %v2456_v2 }
  0x32   : > { %319 = vrot.lane.b32.xlu0 %v272_v48, %s2455_s29  ;;  %646 = vst.msk [vmem:[#allocation2 + $0x10] sm:$0x3] %vm645_vm3, %v2456_v2  ;;  %650 = vst.msk [vmem:[#allocation2 + $0x1a8] sm:$0x3] %vm645_vm3, %v2456_v2 }
  0x33   : > { %321 = vrot.lane.b32.xlu1 %v273_v49, %s2455_s29 }
  0x39   : > { %v820_v23 = vld [vmem:[#allocation2 + $0x9] sm:$0xff] }
  0x3a   : > { %v856_v32 = vmul.f32 %v2704_v16, %v820_v23  ;;  %v920_v38 = vld [vmem:[#allocation2 + $0xa] sm:$0xff] }
  0x3c   : > { %v888_v49 = vadd.f32 %v856_v32, %v756_v31 }
  0x84   : > { %v292_v50 = vpop.permute.xlu0 %291 }
  0x85   : > { %2365 = vmatprep.mubr.msk.bf16.mxu0 %vm323_vm1, %v292_v50  ;;  %v296_v51 = vpop.permute.xlu1 %295  ;;  %v955_v50 = vmul.f32 %v2716_v33, %v919_v37 }
  0x8a   : > { %v294_v52 = vpop.permute.xlu0 %293 }
  0x8b   : > { %2366 = vmatmul.mubr.msk.bf16.vlgmr.msra.gmra.mxu0 %vm323_vm1, %v294_v52  ;;  %v1253_v52 = vsub.s32 5, %v2680_v6 }
  0x8c   : > { %2369 = vmatprep.mubr.msk.bf16.mxu0 %vm323_vm1, %v296_v51  ;;  %v298_v53 = vpop.permute.xlu1 %297  ;;  %v956_v51 = vmul.f32 %v2716_v33, %v920_v38 }
  0x8d   : > { %v2750_v3 = vrot.slane %v2686_v8, %v1253_v52 }
  0x8e   : > { %v988_v2 = vadd.f32 %v956_v51, %v888_v49 }
  0x90   : > { %v300_v54 = vpop.permute.xlu0 %299 }
  0x91   : > { %v302_v55 = vpop.permute.xlu1 %301 }
  0x93   : > { %2370 = vmatmul.mubr.msk.bf16.gmra.mxu0 %vm323_vm1, %v298_v53 }
  0x94   : > { %2373 = vmatprep.mubr.msk.bf16.mxu0 %vm323_vm1, %v300_v54  ;;  %v304_v56 = vpop.permute.xlu0 %303 }
  0x95   : > { %v306_v57 = vpop.permute.xlu1 %305 }
  0x98   : > { %v308_v58 = vpop.permute.xlu0 %307 }
  0x99   : > { %v310_v59 = vpop.permute.xlu1 %309 }
  0x9b   : > { %2374 = vmatmul.mubr.msk.bf16.gmra.mxu0 %vm323_vm1, %v302_v55 }
  0x9c   : > { %2377 = vmatprep.mubr.msk.bf16.mxu0 %vm323_vm1, %v304_v56  ;;  %v312_v60 = vpop.permute.xlu0 %311  ;;  %v2735_v56 = vrot.slane %v2686_v8, %v1354_v39 }
  0x9d   : > { %v314_v61 = vpop.permute.xlu1 %313 }
  0xa0   : > { %v316_v62 = vpop.permute.xlu0 %315 }
  0xa1   : > { %v318_v63 = vpop.permute.xlu1 %317 }
  0xa3   : > { %2378 = vmatmul.mubr.msk.bf16.gmra.mxu0 %vm323_vm1, %v306_v57 }
  0xa4   : > { %2381 = vmatprep.mubr.msk.bf16.mxu0 %vm323_vm1, %v308_v58  ;;  %v320_v0 = vpop.permute.xlu0 %319  ;;  %v2738_v58 = vrot.slane %v2686_v8, %v1053_v41 }
  0xa5   : > { %v322_v1 = vpop.permute.xlu1 %321 }
  0xab   : > { %2382 = vmatmul.mubr.msk.bf16.gmra.mxu0 %vm323_vm1, %v310_v59  ;;  %v2741_v59 = vrot.slane %v2686_v8, %v1153_v42 }
  0xac   : > { %2385 = vmatprep.mubr.msk.bf16.mxu0 %vm323_vm1, %v312_v60  ;;  %v2744_v60 = vrot.slane %v2686_v8, %v1454_v43 }
  0xb3   : > { %2386 = vmatmul.mubr.msk.bf16.gmra.mxu0 %vm323_vm1, %v314_v61 }
  0xb4   : > { %2389 = vmatprep.mubr.msk.bf16.mxu0 %vm323_vm1, %v316_v62 }
  0xbb   : > { %2390 = vmatmul.mubr.msk.bf16.gmra.mxu0 %vm323_vm1, %v318_v63 }
  0xbc   : > { %2393 = vmatprep.mubr.msk.bf16.mxu0 %vm323_vm1, %v320_v0 }
  0xc3   : > { %2394 = vmatmul.mubr.msk.bf16.gmra.mxu0 %vm323_vm1, %v322_v1  ;;  %v987_v1 = vadd.f32 %v955_v50, %v887_v47 }
 0x14b   : > { %v2367_v11 = vpop.f32.mrf.mxu0 }
 0x14c   : > { %v544_v14 = vmul.f32 %v2367_v11, %v2692_v10 }
 0x14d   : > { %v410_v17 = vpop.f32.mrf.mxu0 }
 0x14e   : > { %v581_v20 = vadd.f32 %v2697_v12, %v544_v14  ;;  %v542_v21 = vmul.f32 %v2692_v10, %v410_v17 }
 0x14f   : > { %v2368_v24 = vpop.f32.mrf.mxu0 }
 0x150   : > { %v613_v26 = vmax.f32 %v581_v20, 0.0  ;;  %v579_v27 = vadd.f32 %v2697_v12, %v542_v21  ;;  %v545_v28 = vmul.f32 %v2368_v24, %v2692_v10  ;;  %v2776_v24 = vld [vmem:[%s3734_s2 + $0x8] ss:$0 sm:$0xff] }
 0x151   : > { %v413_v30 = vpop.f32.mrf.mxu0 }
 0x152   : > { %687 = vst.msk [vmem:[#allocation2 + $0x31] sm:$0xff] %vm323_vm1, %v613_v26  ;;  %v611_v34 = vmax.f32 %v579_v27, 0.0  ;;  %v582_v35 = vadd.f32 %v2697_v12, %v545_v28  ;;  %v543_v36 = vmul.f32 %v2692_v10, %v413_v30 }
 0x153   : > { %v2371_v40 = vpop.f32.mrf.mxu0 }
 0x154   : > { %685 = vst.msk [vmem:[#allocation2 + $0x19] sm:$0xff] %vm323_vm1, %v611_v34  ;;  %v614_v44 = vmax.f32 %v582_v35, 0.0  ;;  %v580_v45 = vadd.f32 %v2697_v12, %v543_v36  ;;  %v548_v46 = vmul.f32 %v2371_v40, %v2692_v10 }
 0x155   : > { %v426_v48 = vpop.f32.mrf.mxu0 }
 0x156   : > { %688 = vst.msk [vmem:[#allocation2 + $0x39] sm:$0xff] %vm323_vm1, %v614_v44  ;;  %v612_v53 = vmax.f32 %v580_v45, 0.0  ;;  %v585_v54 = vadd.f32 %v2697_v12, %v548_v46  ;;  %v546_v55 = vmul.f32 %v2692_v10, %v426_v48 }
 0x157   : > { %v2372_v57 = vpop.f32.mrf.mxu0 }
 0x158   : > { %686 = vst.msk [vmem:[#allocation2 + $0x21] sm:$0xff] %vm323_vm1, %v612_v53  ;;  %v617_v61 = vmax.f32 %v585_v54, 0.0  ;;  %v583_v62 = vadd.f32 %v2697_v12, %v546_v55  ;;  %v549_v63 = vmul.f32 %v2372_v57, %v2692_v10 }
 0x159   : > { %v429_v0 = vpop.f32.mrf.mxu0  ;;  %v1320_v4 = vld [vmem:[#allocation2 + $0x30] sm:$0xff] }
 0x15a   : > { %v1420_v5 = vld [vmem:[#allocation2 + $0x31] sm:$0xff]  ;;  %691 = vst.msk [vmem:[#allocation2 + $0x61] sm:$0xff] %vm323_vm1, %v617_v61  ;;  %v615_v6 = vmax.f32 %v583_v62, 0.0  ;;  %v586_v7 = vadd.f32 %v2697_v12, %v549_v63  ;;  %v547_v9 = vmul.f32 %v2692_v10, %v429_v0  ;;  %v2756_v11 = vmul.f32 %v2735_v56, %v1320_v4 }
 0x15b   : > { %v2375_v14 = vpop.f32.mrf.mxu0  ;;  %v1019_v15 = vld [vmem:[#allocation2 + $0x18] sm:$0xff]  ;;  %v2759_v18 = vmul.f32 %v2744_v60, %v1420_v5  ;;  %v2762_v8 = vmul.f32 %v1320_v4, %v2738_v58  ;;  %v2765_v19 = vmul.f32 %v1420_v5, %v2741_v59  ;;  %v2768_v20 = vmul.f32 %v1320_v4, %v2700_v13 }
 0x15c   : > { %v1119_v17 = vld [vmem:[#allocation2 + $0x19] sm:$0xff]  ;;  %689 = vst.msk [vmem:[#allocation2 + $0x49] sm:$0xff] %vm323_vm1, %v615_v6  ;;  %v618_v21 = vmax.f32 %v586_v7, 0.0  ;;  %v584_v22 = vadd.f32 %v2697_v12, %v547_v9  ;;  %v552_v23 = vmul.f32 %v2375_v14, %v2692_v10  ;;  %v1055_v25 = vmul.f32 %v2738_v58, %v1019_v15 }
 0x15d   : > { %v442_v26 = vpop.f32.mrf.mxu0  ;;  %v1155_v27 = vmul.f32 %v2741_v59, %v1119_v17  ;;  %v2780_v28 = vld [vmem:[#allocation2 + $0x38] sm:$0xff]  ;;  %v757_v31 = vmul.f32 %v1019_v15, %v2700_v13  ;;  %v857_v32 = vmul.f32 %v1119_v17, %v2704_v16  ;;  %v2789_v34 = vmul.f32 %v1420_v5, %v2704_v16 }
 0x15e   : > { %v2782_v29 = vld [vmem:[#allocation2 + $0x39] sm:$0xff]  ;;  %692 = vst.msk [vmem:[#allocation2 + $0x69] sm:$0xff] %vm323_vm1, %v618_v21  ;;  %v616_v35 = vmax.f32 %v584_v22, 0.0  ;;  %v589_v36 = vadd.f32 %v2697_v12, %v552_v23  ;;  %v550_v37 = vmul.f32 %v2692_v10, %v442_v26  ;;  %v1087_v38 = vadd.f32 %v1055_v25, %v987_v1 }
 0x15f   : > { %v2784_v30 = vld [vmem:[#allocation2 + $0x32] sm:$0xff]  ;;  %v2794_v39 = vld [vmem:[#allocation2 + $0x3a] sm:$0xff]  ;;  %v2376_v40 = vpop.f32.mrf.mxu0  ;;  %v1357_v44 = vmul.f32 %v2735_v56, %v2780_v28  ;;  %v1457_v45 = vmul.f32 %v2744_v60, %v2782_v29  ;;  %v1220_v52 = vld [vmem:[#allocation2 + $0x22] sm:$0xff]  ;;  %v889_v9 = vadd.f32 %v857_v32, %v757_v31 }
 0x160   : > { %v1020_v41 = vld [vmem:[#allocation2 + $0x20] sm:$0xff]  ;;  %v1556_v46 = vmul.f32 %v2776_v24, %v2784_v30  ;;  %v2804_v47 = vmul.f32 %v2776_v24, %v2794_v39  ;;  %690 = vst.msk [vmem:[#allocation2 + $0x51] sm:$0xff] %vm323_vm1, %v616_v35  ;;  %v621_v48 = vmax.f32 %v589_v36, 0.0  ;;  %v587_v49 = vadd.f32 %v2697_v12, %v550_v37 }
 0x161   : > { %v1120_v42 = vld [vmem:[#allocation2 + $0x21] sm:$0xff]  ;;  %v553_v50 = vmul.f32 %v2376_v40, %v2692_v10  ;;  %v1056_v51 = vmul.f32 %v2738_v58, %v1020_v41  ;;  %v445_v53 = vpop.f32.mrf.mxu0  ;;  %v1187_v55 = vadd.f32 %v1155_v27, %v1087_v38  ;;  %v1256_v61 = vmul.f32 %v2750_v3, %v1220_v52 }
 0x162   : > { %v1219_v43 = vld [vmem:[#allocation2 + $0x1a] sm:$0xff]  ;;  %v1156_v54 = vmul.f32 %v2741_v59, %v1120_v42  ;;  %695 = vst.msk [vmem:[#allocation2 + $0x91] sm:$0xff] %vm323_vm1, %v621_v48  ;;  %v619_v62 = vmax.f32 %v587_v49, 0.0  ;;  %v551_v0 = vmul.f32 %v2692_v10, %v445_v53  ;;  %v758_v6 = vmul.f32 %v1020_v41, %v2700_v13  ;;  %v2836_v49 = vld [vmem:[%s3736_s4 + $0x2] ss:$0 sm:$0xff] }
 0x163   : > { %v1255_v57 = vmul.f32 %v2750_v3, %v1219_v43  ;;  %v590_v63 = vadd.f32 %v2697_v12, %v553_v50  ;;  %v1088_v1 = vadd.f32 %v1056_v51, %v988_v2  ;;  %v2379_v4 = vpop.f32.mrf.mxu0  ;;  %v858_v7 = vmul.f32 %v1120_v42, %v2704_v16 }
 0x164   : > { %693 = vst.msk [vmem:[#allocation2 + $0x79] sm:$0xff] %vm323_vm1, %v619_v62  ;;  %v588_v15 = vadd.f32 %v2697_v12, %v551_v0  ;;  %v556_v17 = vmul.f32 %v2379_v4, %v2692_v10  ;;  %v957_v2 = vmul.f32 %v1219_v43, %v2716_v33  ;;  %v958_v26 = vmul.f32 %v1220_v52, %v2716_v33 }
 0x165   : > { %v1287_v5 = vadd.f32 %v1255_v57, %v1187_v55  ;;  %v622_v14 = vmax.f32 %v590_v63, 0.0  ;;  %v1188_v21 = vadd.f32 %v1156_v54, %v1088_v1  ;;  %v458_v22 = vpop.f32.mrf.mxu0  ;;  %v890_v25 = vadd.f32 %v858_v7, %v758_v6 }
 0x166   : > { %v620_v27 = vmax.f32 %v588_v15, 0.0  ;;  %v593_v31 = vadd.f32 %v2697_v12, %v556_v17  ;;  %v554_v32 = vmul.f32 %v2692_v10, %v458_v22  ;;  %v989_v38 = vadd.f32 %v957_v2, %v889_v9  ;;  %v2861_v9 = vld [vmem:[#allocation2 + $0x49] sm:$0xff] }
 0x167   : > { %v1388_v23 = vadd.f32 %v2756_v11, %v1287_v5  ;;  %696 = vst.msk [vmem:[#allocation2 + $0x99] sm:$0xff] %vm323_vm1, %v622_v14  ;;  %v1288_v35 = vadd.f32 %v1256_v61, %v1188_v21  ;;  %v2380_v36 = vpop.f32.mrf.mxu0  ;;  %v990_v40 = vadd.f32 %v958_v26, %v890_v25  ;;  %v1058_v11 = vmul.f32 %v2780_v28, %v2738_v58  ;;  %v2847_v61 = vld [vmem:[%s3736_s4 + $0x3] ss:$0 sm:$0xff]  ;;  %v2859_v7 = vld [vmem:[#allocation2 + $0x50] sm:$0xff] }
 0x168   : > { %694 = vst.msk [vmem:[#allocation2 + $0x81] sm:$0xff] %vm323_vm1, %v620_v27  ;;  %v625_v41 = vmax.f32 %v593_v31, 0.0  ;;  %v591_v42 = vadd.f32 %v2697_v12, %v554_v32  ;;  %v557_v43 = vmul.f32 %v2380_v36, %v2692_v10  ;;  %v1089_v51 = vadd.f32 %v2762_v8, %v989_v38  ;;  %v2872_v2 = vld [vmem:[#allocation2 + $0x51] sm:$0xff] }
 0x169   : > { %v1488_v37 = vadd.f32 %v2759_v18, %v1388_v23  ;;  %v1389_v48 = vadd.f32 %v1357_v44, %v1288_v35  ;;  %v461_v50 = vpop.f32.mrf.mxu0  ;;  %v1090_v52 = vadd.f32 %v1058_v11, %v990_v40  ;;  %v1158_v53 = vmul.f32 %v2782_v29, %v2741_v59  ;;  %v2874_v26 = vld [vmem:[#allocation2 + $0x4a] sm:$0xff] }
 0x16a   : > { %699 = vst.msk [vmem:[#allocation2 + $0xc1] sm:$0xff] %vm323_vm1, %v625_v41  ;;  %v623_v54 = vmax.f32 %v591_v42, 0.0  ;;  %v594_v55 = vadd.f32 %v2697_v12, %v557_v43  ;;  %v555_v44 = vmul.f32 %v2692_v10, %v461_v50  ;;  %v1189_v63 = vadd.f32 %v2765_v19, %v1089_v51  ;;  %v2884_v41 = vld [vmem:[#allocation2 + $0x52] sm:$0xff] }
 0x16b   : > { %v1588_v18 = vadd.f32 %v1556_v46, %v1488_v37  ;;  %v1489_v57 = vadd.f32 %v1457_v45, %v1389_v48  ;;  %v2849_v46 = vld [vmem:[#allocation2 + $0x48] sm:$0xff]  ;;  %v2383_v8 = vpop.f32.mrf.mxu0  ;;  %v1190_v0 = vadd.f32 %v1158_v53, %v1090_v52  ;;  %v1257_v1 = vmul.f32 %v2784_v30, %v2750_v3 }
 0x16c   : > { %697 = vst.msk [vmem:[#allocation2 + $0xa9] sm:$0xff] %vm323_vm1, %v623_v54  ;;  %v626_v4 = vmax.f32 %v594_v55, 0.0  ;;  %v592_v45 = vadd.f32 %v2697_v12, %v555_v44  ;;  %v560_v5 = vmul.f32 %v2383_v8, %v2692_v10  ;;  %v1258_v15 = vmul.f32 %v2794_v39, %v2750_v3 }
 0x16d   : > { %v1625_v62 = vmul.f32 %v2836_v49, %v1588_v18  ;;  %v1589_v6 = vadd.f32 %v2804_v47, %v1489_v57  ;;  %v474_v14 = vpop.f32.mrf.mxu0  ;;  %v1289_v17 = vadd.f32 %v1257_v1, %v1189_v63  ;;  %v1358_v21 = vmul.f32 %v2735_v56, %v2849_v46 }
 0x16e   : > { %700 = vst.msk [vmem:[#allocation2 + $0xc9] sm:$0xff] %vm323_vm1, %v626_v4  ;;  %v624_v22 = vmax.f32 %v592_v45, 0.0  ;;  %v597_v23 = vadd.f32 %v2697_v12, %v560_v5  ;;  %v558_v47 = vmul.f32 %v2692_v10, %v474_v14  ;;  %v1290_v31 = vadd.f32 %v1258_v15, %v1190_v0 }
 0x16f   : > { %v1662_v19 = vadd.f32 %v2847_v61, %v1625_v62  ;;  %v1626_v25 = vmul.f32 %v2836_v49, %v1589_v6  ;;  %v2384_v27 = vpop.f32.mrf.mxu0  ;;  %v1359_v32 = vmul.f32 %v2735_v56, %v2859_v7  ;;  %v1390_v35 = vadd.f32 %v1358_v21, %v1289_v17 }
 0x170   : > { %v1458_v36 = vmul.f32 %v2744_v60, %v2861_v9  ;;  %698 = vst.msk [vmem:[#allocation2 + $0xb1] sm:$0xff] %vm323_vm1, %v624_v22  ;;  %v629_v37 = vmax.f32 %v597_v23, 0.0  ;;  %v595_v38 = vadd.f32 %v2697_v12, %v558_v47  ;;  %v561_v40 = vmul.f32 %v2384_v27, %v2692_v10 }
 0x171   : > { %v1663_v11 = vadd.f32 %v2847_v61, %v1626_v25  ;;  %v477_v42 = vpop.f32.mrf.mxu0  ;;  %v1391_v43 = vadd.f32 %v1359_v32, %v1290_v31  ;;  %v1459_v48 = vmul.f32 %v2744_v60, %v2872_v2  ;;  %v1558_v18 = vmul.f32 %v2776_v24, %v2874_v26 }
 0x172   : > { %v1490_v50 = vadd.f32 %v1458_v36, %v1390_v35  ;;  %703 = vst.msk [vmem:[#allocation2 + $0xf1] sm:$0xff] %vm323_vm1, %v629_v37  ;;  %v627_v51 = vmax.f32 %v595_v38, 0.0  ;;  %v598_v52 = vadd.f32 %v2697_v12, %v561_v40  ;;  %v559_v53 = vmul.f32 %v2692_v10, %v477_v42  ;;  %v2928_v42 = vld [vmem:[#allocation2 + $0x60] sm:$0xff] }
 0x173   : > { %v1694_v54 = vpack.c.bf16 %v1663_v11, %v1662_v19  ;;  %v2387_v55 = vpop.f32.mrf.mxu0  ;;  %v1491_v44 = vadd.f32 %v1459_v48, %v1391_v43  ;;  %v1559_v57 = vmul.f32 %v2776_v24, %v2884_v41  ;;  %v760_v62 = vmul.f32 %v2780_v28, %v2700_v13  ;;  %v2930_v43 = vld [vmem:[#allocation2 + $0x68] sm:$0xff] }
 0x174   : > { %v1590_v8 = vadd.f32 %v1558_v18, %v1490_v50  ;;  %701 = vst.msk [vmem:[#allocation2 + $0xd9] sm:$0xff] %vm323_vm1, %v627_v51  ;;  %v630_v63 = vmax.f32 %v598_v52, 0.0  ;;  %v596_v0 = vadd.f32 %v2697_v12, %v559_v53  ;;  %v564_v1 = vmul.f32 %v2387_v55, %v2692_v10  ;;  %v2936_v53 = vld [vmem:[#allocation2 + $0x61] sm:$0xff] }
 0x175   : > { %2399 = vmatprep.mubr.msk.bf16.mxu1 %vm323_vm1, %v1694_v54  ;;  %v860_v4 = vmul.f32 %v2782_v29, %v2704_v16  ;;  %v490_v45 = vpop.f32.mrf.mxu0  ;;  %v1591_v5 = vadd.f32 %v1559_v57, %v1491_v44  ;;  %v891_v14 = vadd.f32 %v2789_v34, %v2768_v20  ;;  %v959_v28 = vmul.f32 %v2784_v30, %v2716_v33 }
 0x176   : > { %v1627_v6 = vmul.f32 %v2836_v49, %v1590_v8  ;;  %704 = vst.msk [vmem:[#allocation2 + $0xf9] sm:$0xff] %vm323_vm1, %v630_v63  ;;  %v628_v19 = vmax.f32 %v596_v0, 0.0  ;;  %v601_v15 = vadd.f32 %v2697_v12, %v564_v1  ;;  %v562_v17 = vmul.f32 %v2692_v10, %v490_v45  ;;  %v2941_v8 = vld [vmem:[#allocation2 + $0x69] sm:$0xff] }
 0x177   : > { %v892_v21 = vadd.f32 %v860_v4, %v760_v62  ;;  %v2388_v22 = vpop.f32.mrf.mxu0  ;;  %v1628_v29 = vmul.f32 %v2836_v49, %v1591_v5  ;;  %v960_v47 = vmul.f32 %v2794_v39, %v2716_v33  ;;  %v991_v20 = vadd.f32 %v959_v28, %v891_v14  ;;  %v2943_v62 = vld [vmem:[#allocation2 + $0x62] sm:$0xff]  ;;  %v2945_v63 = vld [vmem:[#allocation2 + $0x6a] sm:$0xff] }
 0x178   : > { %v1664_v23 = vadd.f32 %v2847_v61, %v1627_v6  ;;  %702 = vst.msk [vmem:[#allocation2 + $0xe1] sm:$0xff] %vm323_vm1, %v628_v19  ;;  %v633_v30 = vmax.f32 %v601_v15, 0.0  ;;  %v599_v34 = vadd.f32 %v2697_v12, %v562_v17  ;;  %v565_v25 = vmul.f32 %v2388_v22, %v2692_v10 }
 0x179   : > { %v1059_v27 = vmul.f32 %v2849_v46, %v2738_v58  ;;  %v1665_v31 = vadd.f32 %v2847_v61, %v1628_v29  ;;  %v493_v32 = vpop.f32.mrf.mxu0  ;;  %v992_v35 = vadd.f32 %v960_v47, %v892_v21  ;;  %v1060_v36 = vmul.f32 %v2859_v7, %v2738_v58 }
 0x17a   : > { %v1159_v39 = vmul.f32 %v2861_v9, %v2741_v59  ;;  %707 = vst.msk [vmem:[#allocation2 + $0x121] sm:$0xff] %vm323_vm1, %v633_v30  ;;  %v631_v37 = vmax.f32 %v599_v34, 0.0  ;;  %v602_v38 = vadd.f32 %v2697_v12, %v565_v25  ;;  %v563_v40 = vmul.f32 %v2692_v10, %v493_v32 }
 0x17b   : > { %v1091_v11 = vadd.f32 %v1059_v27, %v991_v20  ;;  %v1695_v48 = vpack.c.bf16 %v1665_v31, %v1664_v23  ;;  %v2391_v50 = vpop.f32.mrf.mxu0  ;;  %v1092_v18 = vadd.f32 %v1060_v36, %v992_v35  ;;  %v1160_v51 = vmul.f32 %v2872_v2, %v2741_v59 }
 0x17c   : > { %v1259_v52 = vmul.f32 %v2874_v26, %v2750_v3  ;;  %705 = vst.msk [vmem:[#allocation2 + $0x109] sm:$0xff] %vm323_vm1, %v631_v37  ;;  %v634_v54 = vmax.f32 %v602_v38, 0.0  ;;  %v600_v55 = vadd.f32 %v2697_v12, %v563_v40  ;;  %v568_v44 = vmul.f32 %v2391_v50, %v2692_v10 }
 0x17d   : > { %v1191_v57 = vadd.f32 %v1159_v39, %v1091_v11  ;;  %2400 = vmatmul.mubr.msk.bf16.vlgmr.msra.gmra.mxu1 %vm323_vm1, %v1695_v48  ;;  %v1192_v0 = vadd.f32 %v1160_v51, %v1092_v18  ;;  %v1260_v1 = vmul.f32 %v2884_v41, %v2750_v3  ;;  %v1360_v4 = vmul.f32 %v2735_v56, %v2928_v42  ;;  %v506_v5 = vpop.f32.mrf.mxu0 }
 0x17e   : > { %v1361_v45 = vmul.f32 %v2735_v56, %v2930_v43  ;;  %708 = vst.msk [vmem:[#allocation2 + $0x129] sm:$0xff] %vm323_vm1, %v634_v54  ;;  %v632_v6 = vmax.f32 %v600_v55, 0.0  ;;  %v605_v14 = vadd.f32 %v2697_v12, %v568_v44  ;;  %v1460_v19 = vmul.f32 %v2744_v60, %v2936_v53  ;;  %v2984_v54 = vld [vmem:[#allocation2 + $0x78] sm:$0xff]  ;;  %v2993_v44 = vld [vmem:[#allocation2 + $0x80] sm:$0xff] }
 0x17f   : > { %v1291_v28 = vadd.f32 %v1259_v52, %v1191_v57  ;;  %v1292_v15 = vadd.f32 %v1260_v1, %v1192_v0  ;;  %v1461_v17 = vmul.f32 %v2744_v60, %v2941_v8  ;;  %v1560_v21 = vmul.f32 %v2776_v24, %v2943_v62  ;;  %v2392_v29 = vpop.f32.mrf.mxu0  ;;  %v2995_v57 = vld [vmem:[#allocation2 + $0x79] sm:$0xff] }
 0x180   : > { %v1561_v22 = vmul.f32 %v2776_v24, %v2945_v63  ;;  %706 = vst.msk [vmem:[#allocation2 + $0x111] sm:$0xff] %vm323_vm1, %v632_v6  ;;  %v637_v23 = vmax.f32 %v605_v14, 0.0  ;;  %v566_v20 = vmul.f32 %v2692_v10, %v506_v5  ;;  %v569_v30 = vmul.f32 %v2392_v29, %v2692_v10  ;;  %v3002_v5 = vld [vmem:[#allocation2 + $0x81] sm:$0xff] }
 0x181   : > { %v1392_v47 = vadd.f32 %v1360_v4, %v1291_v28  ;;  %v1393_v34 = vadd.f32 %v1361_v45, %v1292_v15  ;;  %v761_v25 = vmul.f32 %v2849_v46, %v2700_v13  ;;  %v762_v27 = vmul.f32 %v2859_v7, %v2700_v13  ;;  %v509_v50 = vpop.f32.mrf.mxu0  ;;  %v3004_v6 = vld [vmem:[#allocation2 + $0x7a] sm:$0xff] }
 0x182   : > { %v861_v31 = vmul.f32 %v2861_v9, %v2704_v16  ;;  %711 = vst.msk [vmem:[#allocation2 + $0x151] sm:$0xff] %vm323_vm1, %v637_v23  ;;  %v603_v35 = vadd.f32 %v2697_v12, %v566_v20  ;;  %v606_v36 = vadd.f32 %v2697_v12, %v569_v30  ;;  %v862_v39 = vmul.f32 %v2872_v2, %v2704_v16 }
 0x183   : > { %v1492_v32 = vadd.f32 %v1460_v19, %v1392_v47  ;;  %v1493_v37 = vadd.f32 %v1461_v17, %v1393_v34  ;;  %v961_v46 = vmul.f32 %v2874_v26, %v2716_v33  ;;  %v962_v7 = vmul.f32 %v2884_v41, %v2716_v33  ;;  %v2395_v17 = vpop.f32.mrf.mxu0 }
 0x184   : > { %v893_v38 = vadd.f32 %v861_v31, %v761_v25  ;;  %v635_v9 = vmax.f32 %v603_v35, 0.0  ;;  %v638_v11 = vmax.f32 %v606_v36, 0.0  ;;  %v894_v48 = vadd.f32 %v862_v39, %v762_v27 }
 0x185   : > { %v1592_v40 = vadd.f32 %v1560_v21, %v1492_v32  ;;  %v1593_v18 = vadd.f32 %v1561_v22, %v1493_v37  ;;  %v1061_v52 = vmul.f32 %v2928_v42, %v2738_v58  ;;  %v1062_v41 = vmul.f32 %v2930_v43, %v2738_v58 }
 0x186   : > { %v993_v51 = vadd.f32 %v961_v46, %v893_v38  ;;  %709 = vst.msk [vmem:[#allocation2 + $0x139] sm:$0xff] %vm323_vm1, %v635_v9  ;;  %712 = vst.msk [vmem:[#allocation2 + $0x159] sm:$0xff] %vm323_vm1, %v638_v11  ;;  %v994_v26 = vadd.f32 %v962_v7, %v894_v48  ;;  %v1161_v55 = vmul.f32 %v2936_v53, %v2741_v59  ;;  %v3030_v46 = vld [vmem:[#allocation2 + $0x82] sm:$0xff] }
 0x187   : > { %v1629_v2 = vmul.f32 %v2836_v49, %v1592_v40  ;;  %v1630_v0 = vmul.f32 %v2836_v49, %v1593_v18  ;;  %v1162_v4 = vmul.f32 %v2941_v8, %v2741_v59  ;;  %v1261_v45 = vmul.f32 %v2943_v62, %v2750_v3 }
 0x188   : > { %v1093_v1 = vadd.f32 %v1061_v52, %v993_v51  ;;  %v1094_v28 = vadd.f32 %v1062_v41, %v994_v26  ;;  %v1262_v19 = vmul.f32 %v2945_v63, %v2750_v3  ;;  %v1362_v15 = vmul.f32 %v2735_v56, %v2984_v54  ;;  %v522_v52 = vpop.f32.mrf.mxu0  ;;  %v3046_v41 = vld [vmem:[#allocation2 + $0x90] sm:$0xff] }
 0x189   : > { %v1666_v14 = vadd.f32 %v2847_v61, %v1629_v2  ;;  %v1667_v21 = vadd.f32 %v2847_v61, %v1630_v0  ;;  %v1363_v29 = vmul.f32 %v2735_v56, %v2993_v44  ;;  %v1462_v23 = vmul.f32 %v2744_v60, %v2995_v57 }
 0x18a   : > { %v1193_v22 = vadd.f32 %v1161_v55, %v1093_v1  ;;  %v1194_v47 = vadd.f32 %v1162_v4, %v1094_v28  ;;  %v1463_v20 = vmul.f32 %v2744_v60, %v3002_v5  ;;  %v1562_v30 = vmul.f32 %v2776_v24, %v3004_v6 }
 0x18b   : > { %v567_v34 = vmul.f32 %v2692_v10, %v509_v50  ;;  %v1696_v25 = vpack.c.bf16 %v1667_v21, %v1666_v14  ;;  %v572_v31 = vmul.f32 %v2395_v17, %v2692_v10  ;;  %v763_v32 = vmul.f32 %v2928_v42, %v2700_v13  ;;  %v3057_v14 = vld [vmem:[#allocation2 + $0x99] sm:$0xff] }
 0x18c   : > { %v1293_v27 = vadd.f32 %v1261_v45, %v1193_v22  ;;  %v1294_v35 = vadd.f32 %v1262_v19, %v1194_v47  ;;  %v764_v39 = vmul.f32 %v2930_v43, %v2700_v13  ;;  %v863_v37 = vmul.f32 %v2936_v53, %v2704_v16  ;;  %v3055_v45 = vld [vmem:[#allocation2 + $0x91] sm:$0xff] }
 0x18d   : > { %v604_v36 = vadd.f32 %v2697_v12, %v567_v34  ;;  %2403 = vmatprep.mubr.msk.bf16.mxu1 %vm323_vm1, %v1696_v25  ;;  %v609_v7 = vadd.f32 %v2697_v12, %v572_v31  ;;  %v864_v40 = vmul.f32 %v2941_v8, %v2704_v16  ;;  %v963_v42 = vmul.f32 %v2943_v62, %v2716_v33  ;;  %v3063_v21 = vld [vmem:[#allocation2 + $0x92] sm:$0xff] }
 0x18e   : > { %v1394_v38 = vadd.f32 %v1362_v15, %v1293_v27  ;;  %v1395_v9 = vadd.f32 %v1363_v29, %v1294_v35  ;;  %v895_v48 = vadd.f32 %v863_v37, %v763_v32  ;;  %v964_v43 = vmul.f32 %v2945_v63, %v2716_v33  ;;  %v3048_v63 = vld [vmem:[#allocation2 + $0x98] sm:$0xff] }
 0x18f   : > { %v636_v11 = vmax.f32 %v604_v36, 0.0  ;;  %v641_v50 = vmax.f32 %v609_v7, 0.0  ;;  %v896_v18 = vadd.f32 %v864_v40, %v764_v39  ;;  %v1063_v51 = vmul.f32 %v2984_v54, %v2738_v58 }
 0x190   : > { %v1494_v53 = vadd.f32 %v1462_v23, %v1394_v38  ;;  %v1495_v2 = vadd.f32 %v1463_v20, %v1395_v9  ;;  %v1563_v8 = vmul.f32 %v2776_v24, %v3030_v46  ;;  %v995_v62 = vadd.f32 %v963_v42, %v895_v48  ;;  %v2396_v20 = vpop.f32.mrf.mxu0 }
 0x191   : > { %710 = vst.msk [vmem:[#allocation2 + $0x141] sm:$0xff] %vm323_vm1, %v636_v11  ;;  %v1064_v26 = vmul.f32 %v2993_v44, %v2738_v58  ;;  %715 = vst.msk [vmem:[#allocation2 + $0x181] sm:$0xff] %vm323_vm1, %v641_v50  ;;  %v996_v0 = vadd.f32 %v964_v43, %v896_v18  ;;  %v1163_v1 = vmul.f32 %v2995_v57, %v2741_v59 }
 0x192   : > { %v1594_v55 = vadd.f32 %v1562_v30, %v1494_v53  ;;  %v1164_v4 = vmul.f32 %v3002_v5, %v2741_v59  ;;  %v1595_v28 = vadd.f32 %v1563_v8, %v1495_v2  ;;  %v1095_v19 = vadd.f32 %v1063_v51, %v995_v62  ;;  %v1529_v53 = vld [vmem:[#allocation2 + $0x9a] sm:$0xff] }
 0x193   : > { %v1263_v15 = vmul.f32 %v3004_v6, %v2750_v3  ;;  %v1264_v17 = vmul.f32 %v3030_v46, %v2750_v3  ;;  %v1096_v29 = vadd.f32 %v1064_v26, %v996_v0  ;;  %v1364_v23 = vmul.f32 %v2735_v56, %v3046_v41 }
 0x194   : > { %v1631_v22 = vmul.f32 %v2836_v49, %v1594_v55  ;;  %v1365_v47 = vmul.f32 %v2735_v56, %v3048_v63  ;;  %v1632_v30 = vmul.f32 %v2836_v49, %v1595_v28  ;;  %v1195_v34 = vadd.f32 %v1163_v1, %v1095_v19  ;;  %v3100_v1 = vld [vmem:[#allocation2 + $0xa8] sm:$0xff]  ;;  %v3107_v19 = vld [vmem:[#allocation2 + $0xb0] sm:$0xff] }
 0x195   : > { %v1464_v25 = vmul.f32 %v2744_v60, %v3055_v45  ;;  %v1465_v27 = vmul.f32 %v2744_v60, %v3057_v14  ;;  %v1196_v32 = vadd.f32 %v1164_v4, %v1096_v29  ;;  %v1564_v35 = vmul.f32 %v2776_v24, %v3063_v21 }
 0x196   : > { %v1668_v31 = vadd.f32 %v2847_v61, %v1631_v22  ;;  %v570_v36 = vmul.f32 %v2692_v10, %v522_v52  ;;  %v1669_v39 = vadd.f32 %v2847_v61, %v1632_v30  ;;  %v1295_v37 = vadd.f32 %v1263_v15, %v1195_v34  ;;  %v3109_v15 = vld [vmem:[#allocation2 + $0xa9] sm:$0xff] }
 0x197   : > { %v573_v38 = vmul.f32 %v2396_v20, %v2692_v10  ;;  %v765_v7 = vmul.f32 %v2984_v54, %v2700_v13  ;;  %v1296_v40 = vadd.f32 %v1264_v17, %v1196_v32  ;;  %v766_v9 = vmul.f32 %v2993_v44, %v2700_v13  ;;  %v3117_v20 = vld [vmem:[#allocation2 + $0xaa] sm:$0xff] }
 0x198   : > { %v607_v42 = vadd.f32 %v2697_v12, %v570_v36  ;;  %v865_v11 = vmul.f32 %v2995_v57, %v2704_v16  ;;  %v1697_v48 = vpack.c.bf16 %v1669_v39, %v1668_v31  ;;  %v1396_v43 = vadd.f32 %v1364_v23, %v1295_v37  ;;  %v525_v31 = vpop.f32.mrf.mxu0 }
 0x199   : > { %v610_v50 = vadd.f32 %v2697_v12, %v573_v38  ;;  %v866_v18 = vmul.f32 %v3002_v5, %v2704_v16  ;;  %v1397_v51 = vadd.f32 %v1365_v47, %v1296_v40  ;;  %v965_v2 = vmul.f32 %v3004_v6, %v2716_v33  ;;  %v3115_v47 = vld [vmem:[#allocation2 + $0xb1] sm:$0xff] }
 0x19a   : > { %v639_v52 = vmax.f32 %v607_v42, 0.0  ;;  %v897_v54 = vadd.f32 %v865_v11, %v765_v7  ;;  %2404 = vmatmul.mubr.msk.bf16.gmra.mxu1 %vm323_vm1, %v1697_v48  ;;  %v1496_v44 = vadd.f32 %v1464_v25, %v1396_v43  ;;  %v966_v57 = vmul.f32 %v3030_v46, %v2716_v33 }
 0x19b   : > { %v642_v8 = vmax.f32 %v610_v50, 0.0  ;;  %v898_v62 = vadd.f32 %v866_v18, %v766_v9  ;;  %v1497_v26 = vadd.f32 %v1465_v27, %v1397_v51  ;;  %v1565_v55 = vmul.f32 %v2776_v24, %v1529_v53 }
 0x19c   : > { %713 = vst.msk [vmem:[#allocation2 + $0x169] sm:$0xff] %vm323_vm1, %v639_v52  ;;  %v997_v5 = vadd.f32 %v965_v2, %v897_v54  ;;  %v1065_v0 = vmul.f32 %v3046_v41, %v2738_v58  ;;  %v1596_v6 = vadd.f32 %v1564_v35, %v1496_v44  ;;  %v1066_v28 = vmul.f32 %v3048_v63, %v2738_v58  ;;  %v1531_v2 = vld [vmem:[#allocation2 + $0xb2] sm:$0xff] }
 0x19d   : > { %716 = vst.msk [vmem:[#allocation2 + $0x189] sm:$0xff] %vm323_vm1, %v642_v8  ;;  %v998_v4 = vadd.f32 %v966_v57, %v898_v62  ;;  %v1165_v46 = vmul.f32 %v3055_v45, %v2741_v59  ;;  %v1597_v17 = vadd.f32 %v1565_v55, %v1497_v26  ;;  %v1166_v29 = vmul.f32 %v3057_v14, %v2741_v59 }
 0x19e   : > { %v1097_v22 = vadd.f32 %v1065_v0, %v997_v5  ;;  %v1265_v23 = vmul.f32 %v3063_v21, %v2750_v3  ;;  %v1633_v30 = vmul.f32 %v2836_v49, %v1596_v6  ;;  %v1266_v25 = vmul.f32 %v1529_v53, %v2750_v3  ;;  %v3153_v0 = vld [vmem:[#allocation2 + $0xc0] sm:$0xff]  ;;  %v3155_v6 = vld [vmem:[#allocation2 + $0xc8] sm:$0xff] }
 0x19f   : > { %v1098_v34 = vadd.f32 %v1066_v28, %v998_v4  ;;  %v1366_v27 = vmul.f32 %v2735_v56, %v3100_v1  ;;  %v1634_v32 = vmul.f32 %v2836_v49, %v1597_v17  ;;  %v1367_v36 = vmul.f32 %v2735_v56, %v3107_v19 }
 0x1a0   : > { %v1197_v35 = vadd.f32 %v1165_v46, %v1097_v22  ;;  %v1466_v39 = vmul.f32 %v2744_v60, %v3109_v15  ;;  %v1670_v37 = vadd.f32 %v2847_v61, %v1633_v30  ;;  %v1467_v7 = vmul.f32 %v2744_v60, %v3115_v47  ;;  %v3162_v46 = vld [vmem:[#allocation2 + $0xc1] sm:$0xff]  ;;  %v1433_v30 = vld [vmem:[#allocation2 + $0xc9] sm:$0xff] }
 0x1a1   : > { %v1198_v38 = vadd.f32 %v1166_v29, %v1098_v34  ;;  %v1566_v40 = vmul.f32 %v2776_v24, %v3117_v20  ;;  %v1671_v42 = vadd.f32 %v2847_v61, %v1634_v32  ;;  %v571_v11 = vmul.f32 %v2692_v10, %v525_v31 }
 0x1a2   : > { %v1297_v9 = vadd.f32 %v1265_v23, %v1197_v35  ;;  %v767_v48 = vmul.f32 %v3046_v41, %v2700_v13  ;;  %v768_v50 = vmul.f32 %v3048_v63, %v2700_v13  ;;  %v867_v18 = vmul.f32 %v3055_v45, %v2704_v16 }
 0x1a3   : > { %v1298_v43 = vadd.f32 %v1266_v25, %v1198_v38  ;;  %v868_v51 = vmul.f32 %v3057_v14, %v2704_v16  ;;  %v1698_v52 = vpack.c.bf16 %v1671_v42, %v1670_v37  ;;  %v608_v44 = vadd.f32 %v2697_v12, %v571_v11  ;;  %v1532_v37 = vld [vmem:[#allocation2 + $0xc2] sm:$0xff]  ;;  %v1533_v38 = vld [vmem:[#allocation2 + $0xca] sm:$0xff] }
 0x1a4   : > { %v1398_v54 = vadd.f32 %v1366_v27, %v1297_v9  ;;  %v967_v10 = vmul.f32 %v3063_v21, %v2716_v33  ;;  %v899_v41 = vadd.f32 %v867_v18, %v767_v48  ;;  %v968_v57 = vmul.f32 %v1529_v53, %v2716_v33 }
 0x1a5   : > { %v1399_v8 = vadd.f32 %v1367_v36, %v1298_v43  ;;  %v900_v62 = vadd.f32 %v868_v51, %v768_v50  ;;  %2407 = vmatprep.mubr.msk.bf16.mxu1 %vm323_vm1, %v1698_v52  ;;  %v640_v45 = vmax.f32 %v608_v44, 0.0  ;;  %v1067_v14 = vmul.f32 %v3100_v1, %v2738_v58 }
 0x1a6   : > { %v1498_v63 = vadd.f32 %v1466_v39, %v1398_v54  ;;  %v1068_v26 = vmul.f32 %v3107_v19, %v2738_v58  ;;  %v1567_v12 = vmul.f32 %v2776_v24, %v1531_v2  ;;  %v999_v5 = vadd.f32 %v967_v10, %v899_v41 }
 0x1a7   : > { %v1499_v55 = vadd.f32 %v1467_v7, %v1399_v8  ;;  %v1000_v21 = vadd.f32 %v968_v57, %v900_v62  ;;  %714 = vst.msk [vmem:[#allocation2 + $0x171] sm:$0xff] %vm323_vm1, %v640_v45  ;;  %v1167_v4 = vmul.f32 %v3109_v15, %v2741_v59  ;;  %v1168_v28 = vmul.f32 %v3115_v47, %v2741_v59  ;;  %v3195_v57 = vld [vmem:[#allocation2 + $0xd8] sm:$0xff] }
 0x1a8   : > { %v1598_v53 = vadd.f32 %v1566_v40, %v1498_v63  ;;  %v1099_v22 = vadd.f32 %v1067_v14, %v999_v5  ;;  %v1267_v23 = vmul.f32 %v3117_v20, %v2750_v3  ;;  %v1268_v25 = vmul.f32 %v1531_v2, %v2750_v3  ;;  %v3200_v14 = vld [vmem:[#allocation2 + $0xe0] sm:$0xff] }
 0x1a9   : > { %v1599_v17 = vadd.f32 %v1567_v12, %v1499_v55  ;;  %v1100_v29 = vadd.f32 %v1068_v26, %v1000_v21  ;;  %v1368_v27 = vmul.f32 %v2735_v56, %v3153_v0  ;;  %v1369_v31 = vmul.f32 %v2735_v56, %v3155_v6  ;;  %v3202_v26 = vld [vmem:[#allocation2 + $0xd9] sm:$0xff] }
 0x1aa   : > { %v1635_v34 = vmul.f32 %v2836_v49, %v1598_v53  ;;  %v1199_v35 = vadd.f32 %v1167_v4, %v1099_v22  ;;  %v1468_v39 = vmul.f32 %v2744_v60, %v3162_v46  ;;  %v1469_v40 = vmul.f32 %v2744_v60, %v1433_v30 }
 0x1ab   : > { %v1636_v32 = vmul.f32 %v2836_v49, %v1599_v17  ;;  %v1200_v36 = vadd.f32 %v1168_v28, %v1100_v29  ;;  %v769_v42 = vmul.f32 %v3100_v1, %v2700_v13  ;;  %v770_v9 = vmul.f32 %v3107_v19, %v2700_v13 }
 0x1ac   : > { %v1672_v7 = vadd.f32 %v2847_v61, %v1635_v34  ;;  %v1299_v48 = vadd.f32 %v1267_v23, %v1199_v35  ;;  %v869_v50 = vmul.f32 %v3109_v15, %v2704_v16  ;;  %v1568_v18 = vmul.f32 %v2776_v24, %v1532_v37 }
 0x1ad   : > { %v1673_v11 = vadd.f32 %v2847_v61, %v1636_v32  ;;  %v1300_v43 = vadd.f32 %v1268_v25, %v1200_v36  ;;  %v1569_v51 = vmul.f32 %v2776_v24, %v1533_v38  ;;  %v870_v52 = vmul.f32 %v3115_v47, %v2704_v16 }
 0x1ae   : > { %v969_v1 = vmul.f32 %v3117_v20, %v2716_v33  ;;  %v1400_v44 = vadd.f32 %v1368_v27, %v1299_v48  ;;  %v901_v10 = vadd.f32 %v869_v50, %v769_v42  ;;  %v970_v41 = vmul.f32 %v1531_v2, %v2716_v33  ;;  %v3204_v2 = vld [vmem:[#allocation2 + $0xe1] sm:$0xff] }
 0x1af   : > { %v1699_v54 = vpack.c.bf16 %v1673_v11, %v1672_v7  ;;  %v1401_v19 = vadd.f32 %v1369_v31, %v1300_v43  ;;  %v902_v8 = vadd.f32 %v870_v52, %v770_v9  ;;  %v1069_v15 = vmul.f32 %v3153_v0, %v2738_v58  ;;  %v1534_v11 = vld [vmem:[#allocation2 + $0xda] sm:$0xff]  ;;  %v1535_v50 = vld [vmem:[#allocation2 + $0xe2] sm:$0xff] }
 0x1b0   : > { %v1070_v62 = vmul.f32 %v3155_v6, %v2738_v58  ;;  %v1500_v47 = vadd.f32 %v1468_v39, %v1400_v44  ;;  %v1001_v20 = vadd.f32 %v969_v1, %v901_v10  ;;  %v1169_v45 = vmul.f32 %v3162_v46, %v2741_v59  ;;  %v3237_v10 = vld [vmem:[#allocation2 + $0xf8] sm:$0xff] }
 0x1b1   : > { %2408 = vmatmul.mubr.msk.bf16.gmra.mxu1 %vm323_vm1, %v1699_v54  ;;  %v1501_v63 = vadd.f32 %v1469_v40, %v1401_v19  ;;  %v1002_v55 = vadd.f32 %v970_v41, %v902_v8  ;;  %v1170_v12 = vmul.f32 %v1433_v30, %v2741_v59  ;;  %v1269_v5 = vmul.f32 %v1532_v37, %v2750_v3 }
 0x1b2   : > { %v1270_v21 = vmul.f32 %v1533_v38, %v2750_v3  ;;  %v1600_v53 = vadd.f32 %v1568_v18, %v1500_v47  ;;  %v1101_v28 = vadd.f32 %v1069_v15, %v1001_v20  ;;  %v1370_v17 = vmul.f32 %v2735_v56, %v3195_v57 }
 0x1b3   : > { %v1601_v4 = vadd.f32 %v1569_v51, %v1501_v63  ;;  %v1102_v22 = vadd.f32 %v1070_v62, %v1002_v55  ;;  %v1371_v29 = vmul.f32 %v2735_v56, %v3200_v14  ;;  %v1470_v23 = vmul.f32 %v2744_v60, %v3202_v26  ;;  %v3245_v62 = vld [vmem:[#allocation2 + $0xf1] sm:$0xff]  ;;  %v3248_v55 = vld [vmem:[#allocation2 + $0xf9] sm:$0xff] }
 0x1b4   : > { %v1471_v34 = vmul.f32 %v2744_v60, %v3204_v2  ;;  %v1637_v25 = vmul.f32 %v2836_v49, %v1600_v53  ;;  %v1201_v31 = vadd.f32 %v1169_v45, %v1101_v28  ;;  %v771_v32 = vmul.f32 %v3153_v0, %v2700_v13 }
 0x1b5   : > { %v1638_v27 = vmul.f32 %v2836_v49, %v1601_v4  ;;  %v1202_v35 = vadd.f32 %v1170_v12, %v1102_v22  ;;  %v772_v36 = vmul.f32 %v3155_v6, %v2700_v13  ;;  %v871_v39 = vmul.f32 %v3162_v46, %v2704_v16 }
 0x1b6   : > { %v872_v7 = vmul.f32 %v1433_v30, %v2704_v16  ;;  %v1674_v40 = vadd.f32 %v2847_v61, %v1637_v25  ;;  %v1301_v9 = vadd.f32 %v1269_v5, %v1201_v31  ;;  %v971_v48 = vmul.f32 %v1532_v37, %v2716_v33  ;;  %v3235_v37 = vld [vmem:[#allocation2 + $0xf0] sm:$0xff] }
 0x1b7   : > { %v1675_v42 = vadd.f32 %v2847_v61, %v1638_v27  ;;  %v1302_v43 = vadd.f32 %v1270_v21, %v1202_v35  ;;  %v903_v0 = vadd.f32 %v871_v39, %v771_v32  ;;  %v972_v51 = vmul.f32 %v1533_v38, %v2716_v33 }
 0x1b8   : > { %v904_v18 = vadd.f32 %v872_v7, %v772_v36  ;;  %v1402_v52 = vadd.f32 %v1370_v17, %v1301_v9  ;;  %v1071_v46 = vmul.f32 %v3195_v57, %v2738_v58  ;;  %v1072_v30 = vmul.f32 %v3200_v14, %v2738_v58  ;;  %v1537_v36 = vld [vmem:[#allocation2 + $0xfa] sm:$0xff] }
 0x1b9   : > { %v1700_v6 = vpack.c.bf16 %v1675_v42, %v1674_v40  ;;  %v1403_v1 = vadd.f32 %v1371_v29, %v1302_v43  ;;  %v1570_v54 = vmul.f32 %v2776_v24, %v1534_v11  ;;  %v1003_v44 = vadd.f32 %v971_v48, %v903_v0  ;;  %v1536_v29 = vld [vmem:[#allocation2 + $0xf2] sm:$0xff]  ;;  %v3276_v0 = vld [vmem:[%s3734_s2 + $0x8] ss:$0 sm:$0xff] }
 0x1ba   : > { %v1004_v19 = vadd.f32 %v972_v51, %v904_v18  ;;  %v1502_v38 = vadd.f32 %v1470_v23, %v1402_v52  ;;  %v1571_v8 = vmul.f32 %v2776_v24, %v1535_v50  ;;  %v1171_v41 = vmul.f32 %v3202_v26, %v2741_v59 }
 0x1bb   : > { %2411 = vmatprep.mubr.msk.bf16.mxu1 %vm323_vm1, %v1700_v6  ;;  %v1172_v15 = vmul.f32 %v3204_v2, %v2741_v59  ;;  %v1503_v47 = vadd.f32 %v1471_v34, %v1403_v1  ;;  %v1103_v63 = vadd.f32 %v1071_v46, %v1003_v44  ;;  %v1271_v45 = vmul.f32 %v1534_v11, %v2750_v3  ;;  %v3282_v46 = vld [vmem:[#allocation2 + $0x108] sm:$0xff] }
 0x1bc   : > { %v1104_v20 = vadd.f32 %v1072_v30, %v1004_v19  ;;  %v1602_v12 = vadd.f32 %v1570_v54, %v1502_v38  ;;  %v1272_v5 = vmul.f32 %v1535_v50, %v2750_v3  ;;  %v1372_v21 = vmul.f32 %v2735_v56, %v3235_v37  ;;  %v3284_v30 = vld [vmem:[#allocation2 + $0x110] sm:$0xff] }
 0x1bd   : > { %v1373_v53 = vmul.f32 %v2735_v56, %v3237_v10  ;;  %v1603_v4 = vadd.f32 %v1571_v8, %v1503_v47  ;;  %v1203_v28 = vadd.f32 %v1171_v41, %v1103_v63  ;;  %v1472_v22 = vmul.f32 %v2744_v60, %v3245_v62  ;;  %v3292_v19 = vld [vmem:[#allocation2 + $0x109] sm:$0xff]  ;;  %v3296_v47 = vld [vmem:[#allocation2 + $0x111] sm:$0xff] }
 0x1be   : > { %v1204_v17 = vadd.f32 %v1172_v15, %v1104_v20  ;;  %v1639_v23 = vmul.f32 %v2836_v49, %v1602_v12  ;;  %v1473_v34 = vmul.f32 %v2744_v60, %v3248_v55  ;;  %v773_v25 = vmul.f32 %v3195_v57, %v2700_v13 }
 0x1bf   : > { %v774_v27 = vmul.f32 %v3200_v14, %v2700_v13  ;;  %v1640_v31 = vmul.f32 %v2836_v49, %v1603_v4  ;;  %v1303_v32 = vadd.f32 %v1271_v45, %v1203_v28  ;;  %v873_v39 = vmul.f32 %v3202_v26, %v2704_v16  ;;  %v1538_v28 = vld [vmem:[#allocation2 + $0x10a] sm:$0xff] }
 0x1c0   : > { %v1304_v35 = vadd.f32 %v1272_v5, %v1204_v17  ;;  %v1676_v7 = vadd.f32 %v2847_v61, %v1639_v23  ;;  %v1572_v40 = vmul.f32 %v2776_v24, %v1536_v29  ;;  %v874_v42 = vmul.f32 %v3204_v2, %v2704_v16 }
 0x1c1   : > { %v973_v57 = vmul.f32 %v1534_v11, %v2716_v33  ;;  %v1677_v9 = vadd.f32 %v2847_v61, %v1640_v31  ;;  %v1404_v14 = vadd.f32 %v1372_v21, %v1303_v32  ;;  %v905_v43 = vadd.f32 %v873_v39, %v773_v25 }
 0x1c2   : > { %v1405_v48 = vadd.f32 %v1373_v53, %v1304_v35  ;;  %v1573_v26 = vmul.f32 %v3276_v0, %v1537_v36  ;;  %v906_v18 = vadd.f32 %v874_v42, %v774_v27  ;;  %v974_v24 = vmul.f32 %v1535_v50, %v2716_v33  ;;  %v1539_v35 = vld [vmem:[#allocation2 + $0x112] sm:$0xff] }
 0x1c3   : > { %v1073_v2 = vmul.f32 %v3235_v37, %v2738_v58  ;;  %v1701_v51 = vpack.c.bf16 %v1677_v9, %v1676_v7  ;;  %v1504_v11 = vadd.f32 %v1472_v22, %v1404_v14  ;;  %v1005_v52 = vadd.f32 %v973_v57, %v905_v43 }
 0x1c4   : > { %v1505_v6 = vadd.f32 %v1473_v34, %v1405_v48  ;;  %v1006_v1 = vadd.f32 %v974_v24, %v906_v18  ;;  %v1074_v54 = vmul.f32 %v3237_v10, %v2738_v58  ;;  %v1173_v44 = vmul.f32 %v3245_v62, %v2741_v59  ;;  %v3326_v48 = vld [vmem:[#allocation2 + $0x120] sm:$0xff]  ;;  %v3332_v18 = vld [vmem:[#allocation2 + $0x128] sm:$0xff] }
 0x1c5   : > { %v1174_v50 = vmul.f32 %v3248_v55, %v2741_v59  ;;  %2412 = vmatmul.mubr.msk.bf16.gmra.mxu1 %vm323_vm1, %v1701_v51  ;;  %v1604_v38 = vadd.f32 %v1572_v40, %v1504_v11  ;;  %v1105_v41 = vadd.f32 %v1073_v2, %v1005_v52  ;;  %v1273_v15 = vmul.f32 %v1536_v29, %v2750_v3  ;;  %v3334_v24 = vld [vmem:[#allocation2 + $0x121] sm:$0xff] }
 0x1c6   : > { %v1605_v8 = vadd.f32 %v1573_v26, %v1505_v6  ;;  %v1106_v63 = vadd.f32 %v1074_v54, %v1006_v1  ;;  %v1274_v20 = vmul.f32 %v1537_v36, %v2750_v3  ;;  %v1374_v45 = vmul.f32 %v2735_v56, %v3282_v46  ;;  %v3339_v6 = vld [vmem:[#allocation2 + $0x129] sm:$0xff] }
 0x1c7   : > { %v1375_v12 = vmul.f32 %v2735_v56, %v3284_v30  ;;  %v1641_v5 = vmul.f32 %v2836_v49, %v1604_v38  ;;  %v1205_v53 = vadd.f32 %v1173_v44, %v1105_v41  ;;  %v1474_v4 = vmul.f32 %v2744_v60, %v3292_v19 }
 0x1c8   : > { %v1642_v21 = vmul.f32 %v2836_v49, %v1605_v8  ;;  %v1206_v17 = vadd.f32 %v1174_v50, %v1106_v63  ;;  %v1475_v22 = vmul.f32 %v2744_v60, %v3296_v47  ;;  %v775_v23 = vmul.f32 %v3235_v37, %v2700_v13  ;;  %v3351_v63 = vld [vmem:[%s3736_s4 + $0x2] ss:$0 sm:$0xff] }
 0x1c9   : > { %v776_v34 = vmul.f32 %v3237_v10, %v2700_v13  ;;  %v1678_v25 = vadd.f32 %v2847_v61, %v1641_v5  ;;  %v1305_v49 = vadd.f32 %v1273_v15, %v1205_v53  ;;  %v875_v31 = vmul.f32 %v3245_v62, %v2704_v16  ;;  %v1540_v15 = vld [vmem:[#allocation2 + $0x122] sm:$0xff] }
 0x1ca   : > { %v1679_v27 = vadd.f32 %v2847_v61, %v1642_v21  ;;  %v1306_v32 = vadd.f32 %v1274_v20, %v1206_v17  ;;  %v1574_v39 = vmul.f32 %v3276_v0, %v1538_v28  ;;  %v876_v7 = vmul.f32 %v3248_v55, %v2704_v16 }
 0x1cb   : > { %v975_v37 = vmul.f32 %v1536_v29, %v2716_v33  ;;  %v1406_v42 = vadd.f32 %v1374_v45, %v1305_v49  ;;  %v907_v10 = vadd.f32 %v875_v31, %v775_v23  ;;  %v1075_v57 = vmul.f32 %v3282_v46, %v2738_v58 }
 0x1cc   : > { %v1702_v40 = vpack.c.bf16 %v1679_v27, %v1678_v25  ;;  %v1407_v61 = vadd.f32 %v1375_v12, %v1306_v32  ;;  %v908_v9 = vadd.f32 %v876_v7, %v776_v34  ;;  %v976_v14 = vmul.f32 %v1537_v36, %v2716_v33 }
 0x1cd   : > { %v1076_v62 = vmul.f32 %v3284_v30, %v2738_v58  ;;  %v1506_v55 = vadd.f32 %v1474_v4, %v1406_v42  ;;  %v1575_v29 = vmul.f32 %v3276_v0, %v1539_v35  ;;  %v1007_v43 = vadd.f32 %v975_v37, %v907_v10  ;;  %v1541_v4 = vld [vmem:[#allocation2 + $0x12a] sm:$0xff]  ;;  %v3378_v10 = vld [vmem:[#allocation2 + $0x138] sm:$0xff] }
 0x1ce   : > { %2415 = vmatprep.mubr.msk.bf16.mxu1 %vm323_vm1, %v1702_v40  ;;  %v1175_v26 = vmul.f32 %v3292_v19, %v2741_v59  ;;  %v1507_v2 = vadd.f32 %v1475_v22, %v1407_v61  ;;  %v1008_v36 = vadd.f32 %v976_v14, %v908_v9  ;;  %v1176_v51 = vmul.f32 %v3296_v47, %v2741_v59 }
 0x1cf   : > { %v1275_v11 = vmul.f32 %v1538_v28, %v2750_v3  ;;  %v1606_v52 = vadd.f32 %v1574_v39, %v1506_v55  ;;  %v1107_v1 = vadd.f32 %v1075_v57, %v1007_v43  ;;  %v1276_v54 = vmul.f32 %v1539_v35, %v2750_v3  ;;  %v3386_v55 = vld [vmem:[#allocation2 + $0x139] sm:$0xff] }
 0x1d0   : > { %v1376_v44 = vmul.f32 %v2735_v56, %v3326_v48  ;;  %v1607_v50 = vadd.f32 %v1575_v29, %v1507_v2  ;;  %v1108_v38 = vadd.f32 %v1076_v62, %v1008_v36  ;;  %v1377_v8 = vmul.f32 %v2735_v56, %v3332_v18  ;;  %v3384_v62 = vld [vmem:[#allocation2 + $0x140] sm:$0xff] }
 0x1d1   : > { %v1476_v41 = vmul.f32 %v2744_v60, %v3334_v24  ;;  %v1643_v20 = vmul.f32 %v3351_v63, %v1606_v52  ;;  %v1207_v45 = vadd.f32 %v1175_v26, %v1107_v1  ;;  %v1477_v12 = vmul.f32 %v2744_v60, %v3339_v6  ;;  %v3392_v2 = vld [vmem:[#allocation2 + $0x141] sm:$0xff] }
 0x1d2   : > { %v777_v5 = vmul.f32 %v3282_v46, %v2700_v13  ;;  %v1644_v21 = vmul.f32 %v3351_v63, %v1607_v50  ;;  %v1208_v53 = vadd.f32 %v1176_v51, %v1108_v38  ;;  %v778_v17 = vmul.f32 %v3284_v30, %v2700_v13  ;;  %v3370_v46 = vld [vmem:[%s3736_s4 + $0x3] ss:$0 sm:$0xff] }
 0x1d3   : > { %v877_v22 = vmul.f32 %v3292_v19, %v2704_v16  ;;  %v1307_v23 = vadd.f32 %v1275_v11, %v1207_v45  ;;  %v1576_v34 = vmul.f32 %v3276_v0, %v1540_v15  ;;  %v878_v25 = vmul.f32 %v3296_v47, %v2704_v16 }
 0x1d4   : > { %v977_v27 = vmul.f32 %v1538_v28, %v2716_v33  ;;  %v1680_v49 = vadd.f32 %v3370_v46, %v1643_v20  ;;  %v1681_v30 = vadd.f32 %v3370_v46, %v1644_v21  ;;  %v1308_v31 = vadd.f32 %v1276_v54, %v1208_v53 }
 0x1d5   : > { %v909_v32 = vadd.f32 %v877_v22, %v777_v5  ;;  %v1408_v19 = vadd.f32 %v1376_v44, %v1307_v23  ;;  %v1577_v39 = vmul.f32 %v3276_v0, %v1541_v4  ;;  %v910_v7 = vadd.f32 %v878_v25, %v778_v17  ;;  %v1542_v22 = vld [vmem:[#allocation2 + $0x13a] sm:$0xff] }
 0x1d6   : > { %v978_v37 = vmul.f32 %v1539_v35, %v2716_v33  ;;  %v1703_v47 = vpack.c.bf16 %v1681_v30, %v1680_v49  ;;  %v1409_v40 = vadd.f32 %v1377_v8, %v1308_v31  ;;  %v1077_v42 = vmul.f32 %v3326_v48, %v2738_v58 }
 0x1d7   : > { %v1009_v28 = vadd.f32 %v977_v27, %v909_v32  ;;  %v1508_v57 = vadd.f32 %v1476_v41, %v1408_v19  ;;  %v1078_v9 = vmul.f32 %v3332_v18, %v2738_v58  ;;  %v1177_v14 = vmul.f32 %v3334_v24, %v2741_v59  ;;  %v1543_v27 = vld [vmem:[#allocation2 + $0x142] sm:$0xff] }
 0x1d8   : > { %v1010_v61 = vadd.f32 %v978_v37, %v910_v7  ;;  %2416 = vmatmul.mubr.msk.bf16.gmra.mxu1 %vm323_vm1, %v1703_v47  ;;  %v1509_v35 = vadd.f32 %v1477_v12, %v1409_v40  ;;  %v1178_v43 = vmul.f32 %v3339_v6, %v2741_v59  ;;  %v1277_v26 = vmul.f32 %v1540_v15, %v2750_v3  ;;  %v3422_v7 = vld [vmem:[#allocation2 + $0x150] sm:$0xff] }
 0x1d9   : > { %v1109_v29 = vadd.f32 %v1077_v42, %v1009_v28  ;;  %v1608_v36 = vadd.f32 %v1576_v34, %v1508_v57  ;;  %v1278_v11 = vmul.f32 %v1541_v4, %v2750_v3  ;;  %v1378_v52 = vmul.f32 %v2735_v56, %v3378_v10  ;;  %v3427_v28 = vld [vmem:[#allocation2 + $0x158] sm:$0xff] }
 0x1da   : > { %v1110_v51 = vadd.f32 %v1078_v9, %v1010_v61  ;;  %v1609_v1 = vadd.f32 %v1577_v39, %v1509_v35  ;;  %v1379_v44 = vmul.f32 %v2735_v56, %v3384_v62  ;;  %v1478_v50 = vmul.f32 %v2744_v60, %v3386_v55  ;;  %v3429_v42 = vld [vmem:[#allocation2 + $0x151] sm:$0xff]  ;;  %v3435_v35 = vld [vmem:[#allocation2 + $0x159] sm:$0xff] }
 0x1db   : > { %v1209_v54 = vadd.f32 %v1177_v14, %v1109_v29  ;;  %v1645_v38 = vmul.f32 %v3351_v63, %v1608_v36  ;;  %v1479_v41 = vmul.f32 %v2744_v60, %v3392_v2  ;;  %v779_v20 = vmul.f32 %v3326_v48, %v2700_v13 }
 0x1dc   : > { %v1210_v8 = vadd.f32 %v1178_v43, %v1110_v51  ;;  %v1646_v45 = vmul.f32 %v3351_v63, %v1609_v1  ;;  %v780_v5 = vmul.f32 %v3332_v18, %v2700_v13  ;;  %v879_v21 = vmul.f32 %v3334_v24, %v2704_v16 }
 0x1dd   : > { %v1309_v12 = vadd.f32 %v1277_v26, %v1209_v54  ;;  %v1682_v53 = vadd.f32 %v3370_v46, %v1645_v38  ;;  %v880_v23 = vmul.f32 %v3339_v6, %v2704_v16  ;;  %v979_v34 = vmul.f32 %v1540_v15, %v2716_v33  ;;  %v1544_v38 = vld [vmem:[#allocation2 + $0x152] sm:$0xff] }
 0x1de   : > { %v1310_v17 = vadd.f32 %v1278_v11, %v1210_v8  ;;  %v1683_v48 = vadd.f32 %v3370_v46, %v1646_v45  ;;  %v911_v49 = vadd.f32 %v879_v21, %v779_v20  ;;  %v980_v30 = vmul.f32 %v1541_v4, %v2716_v33  ;;  %v1545_v8 = vld [vmem:[#allocation2 + $0x15a] sm:$0xff] }
 0x1df   : > { %v1410_v25 = vadd.f32 %v1378_v52, %v1309_v12  ;;  %v912_v31 = vadd.f32 %v880_v23, %v780_v5  ;;  %v1079_v24 = vmul.f32 %v3378_v10, %v2738_v58  ;;  %v1080_v32 = vmul.f32 %v3384_v62, %v2738_v58 }
 0x1e0   : > { %v1411_v18 = vadd.f32 %v1379_v44, %v1310_v17  ;;  %v1704_v19 = vpack.c.bf16 %v1683_v48, %v1682_v53  ;;  %v1578_v6 = vmul.f32 %v3276_v0, %v1542_v22  ;;  %v1011_v15 = vadd.f32 %v979_v34, %v911_v49 }
 0x1e1   : > { %v1510_v39 = vadd.f32 %v1478_v50, %v1410_v25  ;;  %v1579_v47 = vmul.f32 %v3276_v0, %v1543_v27  ;;  %v1012_v40 = vadd.f32 %v980_v30, %v912_v31  ;;  %v1179_v4 = vmul.f32 %v3386_v55, %v2741_v59 }
 0x1e2   : > { %v1511_v37 = vadd.f32 %v1479_v41, %v1411_v18  ;;  %2419 = vmatprep.mubr.msk.bf16.mxu1 %vm323_vm1, %v1704_v19  ;;  %v1111_v61 = vadd.f32 %v1079_v24, %v1011_v15  ;;  %v1180_v9 = vmul.f32 %v3392_v2, %v2741_v59  ;;  %v1279_v14 = vmul.f32 %v1542_v22, %v2750_v3  ;;  %v3475_v15 = vld [vmem:[#allocation2 + $0x169] sm:$0xff] }
 0x1e3   : > { %v1610_v57 = vadd.f32 %v1578_v6, %v1510_v39  ;;  %v1112_v43 = vadd.f32 %v1080_v32, %v1012_v40  ;;  %v1280_v26 = vmul.f32 %v1543_v27, %v2750_v3  ;;  %v1380_v36 = vmul.f32 %v2735_v56, %v3422_v7  ;;  %v3468_v32 = vld [vmem:[#allocation2 + $0x170] sm:$0xff] }
 0x1e4   : > { %v1611_v29 = vadd.f32 %v1579_v47, %v1511_v37  ;;  %v1211_v11 = vadd.f32 %v1179_v4, %v1111_v61  ;;  %v1381_v52 = vmul.f32 %v2735_v56, %v3427_v28  ;;  %v1480_v1 = vmul.f32 %v2744_v60, %v3429_v42  ;;  %v3477_v37 = vld [vmem:[#allocation2 + $0x171] sm:$0xff] }
 0x1e5   : > { %v1647_v51 = vmul.f32 %v3351_v63, %v1610_v57  ;;  %v1212_v44 = vadd.f32 %v1180_v9, %v1112_v43  ;;  %v1481_v50 = vmul.f32 %v2744_v60, %v3435_v35  ;;  %v781_v41 = vmul.f32 %v3378_v10, %v2700_v13 }
 0x1e6   : > { %v1648_v54 = vmul.f32 %v3351_v63, %v1611_v29  ;;  %v1311_v45 = vadd.f32 %v1279_v14, %v1211_v11  ;;  %v782_v12 = vmul.f32 %v3384_v62, %v2700_v13  ;;  %v881_v5 = vmul.f32 %v3386_v55, %v2704_v16 }
 0x1e7   : > { %v1684_v20 = vadd.f32 %v3370_v46, %v1647_v51  ;;  %v1312_v53 = vadd.f32 %v1280_v26, %v1212_v44  ;;  %v882_v17 = vmul.f32 %v3392_v2, %v2704_v16  ;;  %v981_v23 = vmul.f32 %v1542_v22, %v2716_v33  ;;  %v3466_v22 = vld [vmem:[#allocation2 + $0x168] sm:$0xff] }
 0x1e8   : > { %v1685_v21 = vadd.f32 %v3370_v46, %v1648_v54  ;;  %v1412_v34 = vadd.f32 %v1380_v36, %v1311_v45  ;;  %v1580_v10 = vmul.f32 %v3276_v0, %v1544_v38  ;;  %v1581_v48 = vmul.f32 %v3276_v0, %v1545_v8 }
 0x1e9   : > { %v913_v25 = vadd.f32 %v881_v5, %v781_v41  ;;  %v1413_v30 = vadd.f32 %v1381_v52, %v1312_v53  ;;  %v914_v62 = vadd.f32 %v882_v17, %v782_v12  ;;  %v982_v18 = vmul.f32 %v1543_v27, %v2716_v33  ;;  %v1546_v41 = vld [vmem:[#allocation2 + $0x16a] sm:$0xff] }
 0x1ea   : > { %v1705_v49 = vpack.c.bf16 %v1685_v21, %v1684_v20  ;;  %v1512_v55 = vadd.f32 %v1480_v1, %v1412_v34  ;;  %v1081_v24 = vmul.f32 %v3422_v7, %v2738_v58  ;;  %v1082_v2 = vmul.f32 %v3427_v28, %v2738_v58  ;;  %v1547_v21 = vld [vmem:[#allocation2 + $0x172] sm:$0xff] }
 0x1eb   : > { %v1013_v31 = vadd.f32 %v981_v23, %v913_v25  ;;  %v1513_v19 = vadd.f32 %v1481_v50, %v1413_v30  ;;  %v1014_v39 = vadd.f32 %v982_v18, %v914_v62  ;;  %v1181_v6 = vmul.f32 %v3429_v42, %v2741_v59  ;;  %v1348_v62 = vld [vmem:[#allocation2 + $0x180] sm:$0xff] }
 0x1ec   : > { %2420 = vmatmul.mubr.msk.bf16.gmra.mxu1 %vm323_vm1, %v1705_v49  ;;  %v1182_v27 = vmul.f32 %v3435_v35, %v2741_v59  ;;  %v1612_v47 = vadd.f32 %v1580_v10, %v1512_v55  ;;  %v1281_v4 = vmul.f32 %v1544_v38, %v2750_v3  ;;  %v1282_v57 = vmul.f32 %v1545_v8, %v2750_v3  ;;  %v1448_v18 = vld [vmem:[#allocation2 + $0x181] sm:$0xff] }
 0x1ed   : > { %v1113_v40 = vadd.f32 %v1081_v24, %v1013_v31  ;;  %v1613_v61 = vadd.f32 %v1581_v48, %v1513_v19  ;;  %v1114_v9 = vadd.f32 %v1082_v2, %v1014_v39  ;;  %v1382_v14 = vmul.f32 %v2735_v56, %v3466_v22  ;;  %v1449_v19 = vld [vmem:[#allocation2 + $0x189] sm:$0xff] }
 0x1ee   : > { %v1383_v29 = vmul.f32 %v2735_v56, %v3468_v32  ;;  %v1649_v43 = vmul.f32 %v3351_v63, %v1612_v47  ;;  %v1482_v36 = vmul.f32 %v2744_v60, %v3475_v15  ;;  %v1483_v51 = vmul.f32 %v2744_v60, %v3477_v37 }
 0x1ef   : > { %v1213_v26 = vadd.f32 %v1181_v6, %v1113_v40  ;;  %v1650_v11 = vmul.f32 %v3351_v63, %v1613_v61  ;;  %v1214_v52 = vadd.f32 %v1182_v27, %v1114_v9  ;;  %v783_v1 = vmul.f32 %v3422_v7, %v2700_v13  ;;  %v1548_v9 = vld [vmem:[#allocation2 + $0x182] sm:$0xff] }
 0x1f0   : > { %v784_v54 = vmul.f32 %v3427_v28, %v2700_v13  ;;  %v1686_v44 = vadd.f32 %v3370_v46, %v1649_v43  ;;  %v883_v20 = vmul.f32 %v3429_v42, %v2704_v16  ;;  %v884_v45 = vmul.f32 %v3435_v35, %v2704_v16 }
 0x1f1   : > { %v1313_v50 = vadd.f32 %v1281_v4, %v1213_v26  ;;  %v1687_v12 = vadd.f32 %v3370_v46, %v1650_v11  ;;  %v1314_v5 = vadd.f32 %v1282_v57, %v1214_v52  ;;  %v983_v53 = vmul.f32 %v1544_v38, %v2716_v33 }
 0x1f2   : > { %v984_v7 = vmul.f32 %v1545_v8, %v2716_v33  ;;  %v915_v28 = vadd.f32 %v883_v20, %v783_v1  ;;  %v916_v23 = vadd.f32 %v884_v45, %v784_v54  ;;  %v1083_v34 = vmul.f32 %v3466_v22, %v2738_v58  ;;  %v1349_v8 = vld [vmem:[#allocation2 + $0x188] sm:$0xff] }
 0x1f3   : > { %v1414_v17 = vadd.f32 %v1382_v14, %v1313_v50  ;;  %v1706_v10 = vpack.c.bf16 %v1687_v12, %v1686_v44  ;;  %v1415_v48 = vadd.f32 %v1383_v29, %v1314_v5  ;;  %v1582_v42 = vmul.f32 %v3276_v0, %v1546_v41  ;;  %v1549_v44 = vld [vmem:[#allocation2 + $0x18a] sm:$0xff] }
 0x1f4   : > { %v1084_v35 = vmul.f32 %v3468_v32, %v2738_v58  ;;  %v1583_v49 = vmul.f32 %v3276_v0, %v1547_v21  ;;  %v1015_v30 = vadd.f32 %v983_v53, %v915_v28  ;;  %v1016_v38 = vadd.f32 %v984_v7, %v916_v23 }
 0x1f5   : > { %v1514_v25 = vadd.f32 %v1482_v36, %v1414_v17  ;;  %2423 = vmatprep.mubr.msk.bf16.mxu1 %vm323_vm1, %v1706_v10  ;;  %v1515_v55 = vadd.f32 %v1483_v51, %v1415_v48  ;;  %v1183_v31 = vmul.f32 %v3475_v15, %v2741_v59  ;;  %v1184_v24 = vmul.f32 %v3477_v37, %v2741_v59  ;;  %v1350_v48 = vld [vmem:[#allocation2 + $0x198] sm:$0xff] }
 0x1f6   : > { %v1283_v2 = vmul.f32 %v1546_v41, %v2750_v3  ;;  %v1115_v6 = vadd.f32 %v1083_v34, %v1015_v30  ;;  %v1116_v27 = vadd.f32 %v1084_v35, %v1016_v38  ;;  %v1284_v47 = vmul.f32 %v1547_v21, %v2750_v3  ;;  %v1351_v35 = vld [vmem:[#allocation2 + $0x1a0] sm:$0xff] }
 0x1f7   : > { %v1614_v39 = vadd.f32 %v1582_v42, %v1514_v25  ;;  %v1615_v40 = vadd.f32 %v1583_v49, %v1515_v55  ;;  %v1384_v4 = vmul.f32 %v2735_v56, %v1348_v62  ;;  %v1385_v57 = vmul.f32 %v2735_v56, %v1349_v8  ;;  %v1450_v30 = vld [vmem:[#allocation2 + $0x199] sm:$0xff] }
 0x1f8   : > { %v1484_v61 = vmul.f32 %v2744_v60, %v1448_v18  ;;  %v1215_v29 = vadd.f32 %v1183_v31, %v1115_v6  ;;  %v1216_v43 = vadd.f32 %v1184_v24, %v1116_v27  ;;  %v1485_v26 = vmul.f32 %v2744_v60, %v1449_v19 }
 0x1f9   : > { %v1651_v14 = vmul.f32 %v3351_v63, %v1614_v39  ;;  %v1652_v36 = vmul.f32 %v3351_v63, %v1615_v40  ;;  %v785_v51 = vmul.f32 %v3466_v22, %v2700_v13  ;;  %v786_v11 = vmul.f32 %v3468_v32, %v2700_v13  ;;  %v1550_v39 = vld [vmem:[#allocation2 + $0x19a] sm:$0xff] }
 0x1fa   : > { %v885_v52 = vmul.f32 %v3475_v15, %v2704_v16  ;;  %v1315_v1 = vadd.f32 %v1283_v2, %v1215_v29  ;;  %v1316_v54 = vadd.f32 %v1284_v47, %v1216_v43  ;;  %v1584_v50 = vmul.f32 %v3276_v0, %v1548_v9 }
 0x1fb   : > { %v886_v20 = vmul.f32 %v3477_v37, %v2704_v16  ;;  %v1688_v45 = vadd.f32 %v3370_v46, %v1651_v14  ;;  %v1689_v12 = vadd.f32 %v3370_v46, %v1652_v36  ;;  %v985_v22 = vmul.f32 %v1546_v41, %v2716_v33 }
 0x1fc   : > { %v917_v5 = vadd.f32 %v885_v52, %v785_v51  ;;  %v1416_v53 = vadd.f32 %v1384_v4, %v1315_v1  ;;  %v1417_v13 = vadd.f32 %v1385_v57, %v1316_v54  ;;  %v986_v15 = vmul.f32 %v1547_v21, %v2716_v33  ;;  %v3567_v54 = vld [vmem:[%s3736_s4 + $0x5] ss:$0 sm:$0xff] }
 0x1fd   : > { %v918_v32 = vadd.f32 %v886_v20, %v786_v11  ;;  %v1707_v7 = vpack.c.bf16 %v1689_v12, %v1688_v45  ;;  %v1585_v17 = vmul.f32 %v3276_v0, %v1549_v44  ;;  %v1085_v23 = vmul.f32 %v1348_v62, %v2738_v58 }
 0x1fe   : > { %v1017_v28 = vadd.f32 %v985_v22, %v917_v5  ;;  %v1516_v34 = vadd.f32 %v1484_v61, %v1416_v53  ;;  %v1517_v16 = vadd.f32 %v1485_v26, %v1417_v13  ;;  %v1086_v10 = vmul.f32 %v1349_v8, %v2738_v58  ;;  %v1451_v8 = vld [vmem:[#allocation2 + $0x1a1] sm:$0xff] }
 0x1ff   : > { %v1018_v37 = vadd.f32 %v986_v15, %v918_v32  ;;  %2424 = vmatmul.mubr.msk.bf16.gmra.mxu1 %vm323_vm1, %v1707_v7  ;;  %v1185_v42 = vmul.f32 %v1448_v18, %v2741_v59  ;;  %v1186_v49 = vmul.f32 %v1449_v19, %v2741_v59  ;;  %v1285_v62 = vmul.f32 %v1548_v9, %v2750_v3  ;;  %v1551_v19 = vld [vmem:[#allocation2 + $0x1a2] sm:$0xff] }
 0x200   : > { %v1117_v41 = vadd.f32 %v1085_v23, %v1017_v28  ;;  %v1616_v25 = vadd.f32 %v1584_v50, %v1516_v34  ;;  %v1617_v33 = vadd.f32 %v1585_v17, %v1517_v16  ;;  %v1286_v55 = vmul.f32 %v1549_v44, %v2750_v3 }
 0x201   : > { %v1118_v21 = vadd.f32 %v1086_v10, %v1018_v37  ;;  %v1386_v58 = vmul.f32 %v2735_v56, %v1350_v48  ;;  %v1387_v2 = vmul.f32 %v2735_v56, %v1351_v35  ;;  %v1486_v59 = vmul.f32 %v2744_v60, %v1450_v30 }
 0x202   : > { %v1217_v38 = vadd.f32 %v1185_v42, %v1117_v41  ;;  %v1653_v31 = vmul.f32 %v3351_v63, %v1616_v25  ;;  %v1654_v24 = vmul.f32 %v3351_v63, %v1617_v33  ;;  %v1487_v40 = vmul.f32 %v2744_v60, %v1451_v8 }
 0x203   : > { %v1218_v18 = vadd.f32 %v1186_v49, %v1118_v21  ;;  %v1586_v57 = vmul.f32 %v3276_v0, %v1550_v39  ;;  %v1587_v14 = vmul.f32 %v3276_v0, %v1551_v19  ;;  %v3562_v0 = vld [vmem:[%s3736_s4 + $0x4] ss:$0 sm:$0xff] }
 0x204   : > { %v1317_v6 = vadd.f32 %v1285_v62, %v1217_v38  ;;  %v1690_v27 = vadd.f32 %v3370_v46, %v1653_v31  ;;  %v1691_v47 = vadd.f32 %v3370_v46, %v1654_v24 }
 0x205   : > { %v1318_v3 = vadd.f32 %v1286_v55, %v1218_v18 }
 0x206   : > { %v1418_v4 = vadd.f32 %v1386_v58, %v1317_v6  ;;  %v1708_v61 = vpack.c.bf16 %v1691_v47, %v1690_v27 }
 0x207   : > { %v1419_v9 = vadd.f32 %v1387_v2, %v1318_v3 }
 0x208   : > { %v1518_v56 = vadd.f32 %v1486_v59, %v1418_v4  ;;  %2427 = vmatprep.mubr.msk.bf16.mxu1 %vm323_vm1, %v1708_v61 }
 0x209   : > { %v1519_v29 = vadd.f32 %v1487_v40, %v1419_v9 }
 0x20a   : > { %v1618_v43 = vadd.f32 %v1586_v57, %v1518_v56 }
 0x20b   : > { %v1619_v26 = vadd.f32 %v1587_v14, %v1519_v29 }
 0x20c   : > { %v1655_v36 = vmul.f32 %v3351_v63, %v1618_v43 }
 0x20d   : > { %v1656_v51 = vmul.f32 %v3351_v63, %v1619_v26 }
 0x20e   : > { %v1692_v11 = vadd.f32 %v3370_v46, %v1655_v36 }
 0x20f   : > { %v1693_v60 = vadd.f32 %v3370_v46, %v1656_v51 }
 0x211   : > { %v1709_v52 = vpack.c.bf16 %v1693_v60, %v1692_v11 }
 0x213   : > { %2428 = vmatmul.mubr.msk.bf16.gmra.mxu1 %vm323_vm1, %v1709_v52 }
 0x23d   : > { %v2401_v1 = vpop.f32.mrf.mxu1 }
 0x23e   : > { %v1930_v63 = vmul.f32 %v2401_v1, %v3562_v0 }
 0x23f   : > { %v1796_v44 = vpop.f32.mrf.mxu1 }
 0x240   : > { %v1967_v50 = vadd.f32 %v3567_v54, %v1930_v63  ;;  %v1928_v46 = vmul.f32 %v3562_v0, %v1796_v44 }
 0x241   : > { %v2402_v20 = vpop.f32.mrf.mxu1 }
 0x242   : > { %v1999_v45 = vmax.f32 %v1967_v50, 0.0  ;;  %v1965_v12 = vadd.f32 %v3567_v54, %v1928_v46  ;;  %v1931_v5 = vmul.f32 %v2402_v20, %v3562_v0 }
 0x243   : > { %v1799_v22 = vpop.f32.mrf.mxu1 }
 0x244   : > { %v1968_v53 = vadd.f32 %v3567_v54, %v1931_v5  ;;  %v1929_v13 = vmul.f32 %v3562_v0, %v1799_v22  ;;  %2097 = vrot.lane.b32.xlu0 %v1999_v45, %s2457_s6  ;;  %v1997_v32 = vmax.f32 %v1965_v12, 0.0 }
 0x246   : > { %v2000_v15 = vmax.f32 %v1968_v53, 0.0  ;;  %v1966_v7 = vadd.f32 %v3567_v54, %v1929_v13 }
 0x248   : > { %2093 = vrot.lane.b32.xlu0 %v1997_v32, %s2457_s6  ;;  %2099 = vrot.lane.b32.xlu1 %v2000_v15, %s2457_s6  ;;  %v1998_v17 = vmax.f32 %v1966_v7, 0.0 }
 0x24c   : > { %2095 = vrot.lane.b32.xlu1 %v1998_v17, %s2457_s6 }
 0x25a   : > { %v2405_v28 = vpop.f32.mrf.mxu1 }
 0x25b   : > { %v1934_v23 = vmul.f32 %v2405_v28, %v3562_v0 }
 0x25c   : > { %v1812_v34 = vpop.f32.mrf.mxu1 }
 0x25d   : > { %v1971_v16 = vadd.f32 %v3567_v54, %v1934_v23  ;;  %v1932_v37 = vmul.f32 %v3562_v0, %v1812_v34 }
 0x25e   : > { %v2406_v10 = vpop.f32.mrf.mxu1 }
 0x25f   : > { %v2003_v48 = vmax.f32 %v1971_v16, 0.0  ;;  %v1969_v41 = vadd.f32 %v3567_v54, %v1932_v37  ;;  %v1935_v42 = vmul.f32 %v2406_v10, %v3562_v0 }
 0x260   : > { %v1815_v35 = vpop.f32.mrf.mxu1 }
 0x261   : > { %v1972_v25 = vadd.f32 %v3567_v54, %v1935_v42  ;;  %v1933_v33 = vmul.f32 %v3562_v0, %v1815_v35  ;;  %2105 = vrot.lane.b32.xlu0 %v2003_v48, %s2457_s6  ;;  %v2001_v21 = vmax.f32 %v1969_v41, 0.0 }
 0x263   : > { %v2004_v49 = vmax.f32 %v1972_v25, 0.0  ;;  %v1970_v30 = vadd.f32 %v3567_v54, %v1933_v33 }
 0x265   : > { %2101 = vrot.lane.b32.xlu0 %v2001_v21, %s2457_s6  ;;  %2107 = vrot.lane.b32.xlu1 %v2004_v49, %s2457_s6  ;;  %v2002_v38 = vmax.f32 %v1970_v30, 0.0 }
 0x269   : > { %2103 = vrot.lane.b32.xlu1 %v2002_v38, %s2457_s6 }
 0x271   : > { %v2409_v62 = vpop.f32.mrf.mxu1 }
 0x272   : > { %v1938_v55 = vmul.f32 %v2409_v62, %v3562_v0 }
 0x273   : > { %v1828_v58 = vpop.f32.mrf.mxu1 }
 0x274   : > { %v1975_v8 = vadd.f32 %v3567_v54, %v1938_v55  ;;  %v1936_v31 = vmul.f32 %v3562_v0, %v1828_v58 }
 0x275   : > { %v2410_v24 = vpop.f32.mrf.mxu1 }
 0x276   : > { %v2007_v18 = vmax.f32 %v1975_v8, 0.0  ;;  %v1973_v2 = vadd.f32 %v3567_v54, %v1936_v31  ;;  %v1939_v39 = vmul.f32 %v2410_v24, %v3562_v0 }
 0x277   : > { %v1831_v6 = vpop.f32.mrf.mxu1 }
 0x278   : > { %v1976_v59 = vadd.f32 %v3567_v54, %v1939_v39  ;;  %v1937_v19 = vmul.f32 %v3562_v0, %v1831_v6  ;;  %2113 = vrot.lane.b32.xlu0 %v2007_v18, %s2457_s6  ;;  %v2005_v27 = vmax.f32 %v1973_v2, 0.0 }
 0x27a   : > { %v2008_v47 = vmax.f32 %v1976_v59, 0.0  ;;  %v1974_v3 = vadd.f32 %v3567_v54, %v1937_v19 }
 0x27c   : > { %2109 = vrot.lane.b32.xlu0 %v2005_v27, %s2457_s6  ;;  %2115 = vrot.lane.b32.xlu1 %v2008_v47, %s2457_s6  ;;  %v2006_v40 = vmax.f32 %v1974_v3, 0.0 }
 0x280   : > { %2111 = vrot.lane.b32.xlu1 %v2006_v40, %s2457_s6 }
 0x285   : > { %v2413_v4 = vpop.f32.mrf.mxu1 }
 0x286   : > { %v1942_v57 = vmul.f32 %v2413_v4, %v3562_v0 }
 0x287   : > { %v1844_v61 = vpop.f32.mrf.mxu1 }
 0x288   : > { %v1979_v9 = vadd.f32 %v3567_v54, %v1942_v57  ;;  %v1940_v14 = vmul.f32 %v3562_v0, %v1844_v61 }
 0x289   : > { %v2414_v56 = vpop.f32.mrf.mxu1 }
 0x28a   : > { %v2011_v29 = vmax.f32 %v1979_v9, 0.0  ;;  %v1977_v43 = vadd.f32 %v3567_v54, %v1940_v14  ;;  %v1943_v26 = vmul.f32 %v2414_v56, %v3562_v0 }
 0x28b   : > { %v1847_v36 = vpop.f32.mrf.mxu1 }
 0x28c   : > { %v1980_v51 = vadd.f32 %v3567_v54, %v1943_v26  ;;  %v1941_v11 = vmul.f32 %v3562_v0, %v1847_v36  ;;  %2121 = vrot.lane.b32.xlu0 %v2011_v29, %s2457_s6  ;;  %v2009_v60 = vmax.f32 %v1977_v43, 0.0 }
 0x28e   : > { %v2012_v52 = vmax.f32 %v1980_v51, 0.0  ;;  %v1978_v1 = vadd.f32 %v3567_v54, %v1941_v11 }
 0x290   : > { %2117 = vrot.lane.b32.xlu0 %v2009_v60, %s2457_s6  ;;  %2123 = vrot.lane.b32.xlu1 %v2012_v52, %s2457_s6  ;;  %v2010_v63 = vmax.f32 %v1978_v1, 0.0 }
 0x294   : > { %2119 = vrot.lane.b32.xlu1 %v2010_v63, %s2457_s6 }
 0x298   : > { %v2417_v44 = vpop.f32.mrf.mxu1 }
 0x299   : > { %v1946_v50 = vmul.f32 %v2417_v44, %v3562_v0 }
 0x29a   : > { %v1860_v46 = vpop.f32.mrf.mxu1 }
 0x29b   : > { %v1983_v20 = vadd.f32 %v3567_v54, %v1946_v50  ;;  %v1944_v45 = vmul.f32 %v3562_v0, %v1860_v46 }
 0x29c   : > { %v2418_v12 = vpop.f32.mrf.mxu1 }
 0x29d   : > { %v2015_v5 = vmax.f32 %v1983_v20, 0.0  ;;  %v1981_v22 = vadd.f32 %v3567_v54, %v1944_v45  ;;  %v1947_v53 = vmul.f32 %v2418_v12, %v3562_v0 }
 0x29e   : > { %v1863_v13 = vpop.f32.mrf.mxu1 }
 0x29f   : > { %v1984_v32 = vadd.f32 %v3567_v54, %v1947_v53  ;;  %v1945_v15 = vmul.f32 %v3562_v0, %v1863_v13  ;;  %2129 = vrot.lane.b32.xlu0 %v2015_v5, %s2457_s6  ;;  %v2013_v7 = vmax.f32 %v1981_v22, 0.0 }
 0x2a1   : > { %v2016_v17 = vmax.f32 %v1984_v32, 0.0  ;;  %v1982_v28 = vadd.f32 %v3567_v54, %v1945_v15 }
 0x2a3   : > { %2125 = vrot.lane.b32.xlu0 %v2013_v7, %s2457_s6  ;;  %2131 = vrot.lane.b32.xlu1 %v2016_v17, %s2457_s6  ;;  %v2014_v23 = vmax.f32 %v1982_v28, 0.0 }
 0x2a7   : > { %2127 = vrot.lane.b32.xlu1 %v2014_v23, %s2457_s6 }
 0x2ac   : > { %v2421_v34 = vpop.f32.mrf.mxu1 }
 0x2ad   : > { %v1950_v16 = vmul.f32 %v2421_v34, %v3562_v0 }
 0x2ae   : > { %v1876_v37 = vpop.f32.mrf.mxu1 }
 0x2af   : > { %v1987_v10 = vadd.f32 %v3567_v54, %v1950_v16  ;;  %v1948_v48 = vmul.f32 %v3562_v0, %v1876_v37 }
 0x2b0   : > { %v2422_v41 = vpop.f32.mrf.mxu1 }
 0x2b1   : > { %v2019_v42 = vmax.f32 %v1987_v10, 0.0  ;;  %v1985_v35 = vadd.f32 %v3567_v54, %v1948_v48  ;;  %v1951_v25 = vmul.f32 %v2422_v41, %v3562_v0 }
 0x2b2   : > { %v1879_v33 = vpop.f32.mrf.mxu1 }
 0x2b3   : > { %v1988_v21 = vadd.f32 %v3567_v54, %v1951_v25  ;;  %v1949_v49 = vmul.f32 %v3562_v0, %v1879_v33  ;;  %2137 = vrot.lane.b32.xlu0 %v2019_v42, %s2457_s6  ;;  %v2017_v30 = vmax.f32 %v1985_v35, 0.0 }
 0x2b5   : > { %v2020_v38 = vmax.f32 %v1988_v21, 0.0  ;;  %v1986_v62 = vadd.f32 %v3567_v54, %v1949_v49 }
 0x2b6   : > { %v2098_v55 = vpop.permute.xlu0 %2097 }
 0x2b7   : > { %2133 = vrot.lane.b32.xlu0 %v2017_v30, %s2457_s6  ;;  %2139 = vrot.lane.b32.xlu1 %v2020_v38, %s2457_s6  ;;  %2192 = vst.msk [vmem:[%s2509_s28 + $0x10] sm:$0xff] %vm2189_vm4, %v2098_v55  ;;  %v2018_v58 = vmax.f32 %v1986_v62, 0.0 }
 0x2ba   : > { %v2100_v8 = vpop.permute.xlu1 %2099  ;;  %v2094_v31 = vpop.permute.xlu0 %2093 }
 0x2bb   : > { %2135 = vrot.lane.b32.xlu1 %v2018_v58, %s2457_s6  ;;  %2193 = vst.msk [vmem:[%s2509_s28 + $0x18] sm:$0xff] %vm2189_vm4, %v2100_v8  ;;  %2190 = vst.msk [vmem:[%s2509_s28] sm:$0xff] %vm2189_vm4, %v2094_v31 }
 0x2be   : > { %v2096_v24 = vpop.permute.xlu1 %2095 }
 0x2bf   : > { %v2425_v18 = vpop.f32.mrf.mxu1  ;;  %2191 = vst.msk [vmem:[%s2509_s28 + $0x8] sm:$0xff] %vm2189_vm4, %v2096_v24 }
 0x2c0   : > { %v1954_v2 = vmul.f32 %v2425_v18, %v3562_v0 }
 0x2c1   : > { %v1892_v39 = vpop.f32.mrf.mxu1 }
 0x2c2   : > { %v1991_v6 = vadd.f32 %v3567_v54, %v1954_v2  ;;  %v1952_v59 = vmul.f32 %v3562_v0, %v1892_v39 }
 0x2c3   : > { %v2426_v19 = vpop.f32.mrf.mxu1 }
 0x2c4   : > { %v2023_v27 = vmax.f32 %v1991_v6, 0.0  ;;  %v1989_v47 = vadd.f32 %v3567_v54, %v1952_v59  ;;  %v1955_v3 = vmul.f32 %v2426_v19, %v3562_v0 }
 0x2c5   : > { %v1895_v40 = vpop.f32.mrf.mxu1 }
 0x2c6   : > { %v1992_v4 = vadd.f32 %v3567_v54, %v1955_v3  ;;  %v1953_v57 = vmul.f32 %v3562_v0, %v1895_v40  ;;  %2145 = vrot.lane.b32.xlu0 %v2023_v27, %s2457_s6  ;;  %v2021_v61 = vmax.f32 %v1989_v47, 0.0 }
 0x2c8   : > { %v2024_v9 = vmax.f32 %v1992_v4, 0.0  ;;  %v1990_v14 = vadd.f32 %v3567_v54, %v1953_v57 }
 0x2ca   : > { %2141 = vrot.lane.b32.xlu0 %v2021_v61, %s2457_s6  ;;  %2147 = vrot.lane.b32.xlu1 %v2024_v9, %s2457_s6  ;;  %v2022_v56 = vmax.f32 %v1990_v14, 0.0 }
 0x2ce   : > { %2143 = vrot.lane.b32.xlu1 %v2022_v56, %s2457_s6 }
 0x2d3   : > { %v2429_v29 = vpop.f32.mrf.mxu1  ;;  %v2106_v43 = vpop.permute.xlu0 %2105 }
 0x2d4   : > { %2196 = vst.msk [vmem:[%s2509_s28 + $0x30] sm:$0xff] %vm2189_vm4, %v2106_v43  ;;  %v1958_v36 = vmul.f32 %v2429_v29, %v3562_v0 }
 0x2d5   : > { %v1908_v26 = vpop.f32.mrf.mxu1 }
 0x2d6   : > { %v1956_v51 = vmul.f32 %v3562_v0, %v1908_v26  ;;  %v1995_v44 = vadd.f32 %v3567_v54, %v1958_v36 }
 0x2d7   : > { %v2430_v11 = vpop.f32.mrf.mxu1  ;;  %v2108_v52 = vpop.permute.xlu1 %2107 }
 0x2d8   : > { %v1993_v60 = vadd.f32 %v3567_v54, %v1956_v51  ;;  %v2102_v1 = vpop.permute.xlu0 %2101  ;;  %2197 = vst.msk [vmem:[%s2509_s28 + $0x38] sm:$0xff] %vm2189_vm4, %v2108_v52  ;;  %v1959_v46 = vmul.f32 %v2430_v11, %v3562_v0  ;;  %v2027_v5 = vmax.f32 %v1995_v44, 0.0 }
 0x2d9   : > { %v1911_v63 = vpop.f32.mrf.mxu1  ;;  %2194 = vst.msk [vmem:[%s2509_s28 + $0x20] sm:$0xff] %vm2189_vm4, %v2102_v1 }
 0x2da   : > { %v2025_v50 = vmax.f32 %v1993_v60, 0.0  ;;  %v1957_v20 = vmul.f32 %v3562_v0, %v1911_v63  ;;  %v1996_v22 = vadd.f32 %v3567_v54, %v1959_v46 }
 0x2db   : > { %v2104_v12 = vpop.permute.xlu1 %2103 }
 0x2dc   : > { %v1994_v45 = vadd.f32 %v3567_v54, %v1957_v20  ;;  %2149 = vrot.lane.b32.xlu0 %v2025_v50, %s2457_s6  ;;  %2195 = vst.msk [vmem:[%s2509_s28 + $0x28] sm:$0xff] %vm2189_vm4, %v2104_v12  ;;  %v2028_v0 = vmax.f32 %v1996_v22, 0.0 }
 0x2de   : > { %v2026_v53 = vmax.f32 %v1994_v45, 0.0 }
 0x2e0   : > { %2153 = vrot.lane.b32.xlu0 %v2027_v5, %s2457_s6  ;;  %2151 = vrot.lane.b32.xlu1 %v2026_v53, %s2457_s6 }
 0x2e4   : > { %2155 = vrot.lane.b32.xlu1 %v2028_v0, %s2457_s6 }
 0x2ea   : > { %v2114_v13 = vpop.permute.xlu0 %2113 }
 0x2eb   : > { %2200 = vst.msk [vmem:[%s2509_s28 + $0x50] sm:$0xff] %vm2189_vm4, %v2114_v13 }
 0x2ee   : > { %v2116_v32 = vpop.permute.xlu1 %2115  ;;  %v2110_v15 = vpop.permute.xlu0 %2109 }
 0x2ef   : > { %2201 = vst.msk [vmem:[%s2509_s28 + $0x58] sm:$0xff] %vm2189_vm4, %v2116_v32  ;;  %2198 = vst.msk [vmem:[%s2509_s28 + $0x40] sm:$0xff] %vm2189_vm4, %v2110_v15 }
 0x2f2   : > { %v2112_v54 = vpop.permute.xlu1 %2111 }
 0x2f3   : > { %2199 = vst.msk [vmem:[%s2509_s28 + $0x48] sm:$0xff] %vm2189_vm4, %v2112_v54 }
 0x2fe   : > { %v2122_v7 = vpop.permute.xlu0 %2121 }
 0x2ff   : > { %2204 = vst.msk [vmem:[%s2509_s28 + $0x70] sm:$0xff] %vm2189_vm4, %v2122_v7 }
 0x302   : > { %v2124_v17 = vpop.permute.xlu1 %2123  ;;  %v2118_v28 = vpop.permute.xlu0 %2117 }
 0x303   : > { %2205 = vst.msk [vmem:[%s2509_s28 + $0x78] sm:$0xff] %vm2189_vm4, %v2124_v17  ;;  %2202 = vst.msk [vmem:[%s2509_s28 + $0x60] sm:$0xff] %vm2189_vm4, %v2118_v28 }
 0x306   : > { %v2120_v23 = vpop.permute.xlu1 %2119 }
 0x307   : > { %2203 = vst.msk [vmem:[%s2509_s28 + $0x68] sm:$0xff] %vm2189_vm4, %v2120_v23 }
 0x311   : > { %v2130_v34 = vpop.permute.xlu0 %2129 }
 0x312   : > { %2208 = vst.msk [vmem:[%s2509_s28 + $0x90] sm:$0xff] %vm2189_vm4, %v2130_v34 }
 0x315   : > { %v2132_v16 = vpop.permute.xlu1 %2131  ;;  %v2126_v37 = vpop.permute.xlu0 %2125 }
 0x316   : > { %2209 = vst.msk [vmem:[%s2509_s28 + $0x98] sm:$0xff] %vm2189_vm4, %v2132_v16  ;;  %2206 = vst.msk [vmem:[%s2509_s28 + $0x80] sm:$0xff] %vm2189_vm4, %v2126_v37 }
 0x319   : > { %v2128_v10 = vpop.permute.xlu1 %2127 }
 0x31a   : > { %2207 = vst.msk [vmem:[%s2509_s28 + $0x88] sm:$0xff] %vm2189_vm4, %v2128_v10 }
 0x325   : > { %v2138_v48 = vpop.permute.xlu0 %2137 }
 0x326   : > { %2212 = vst.msk [vmem:[%s2509_s28 + $0xb0] sm:$0xff] %vm2189_vm4, %v2138_v48 }
 0x329   : > { %v2140_v41 = vpop.permute.xlu1 %2139  ;;  %v2134_v42 = vpop.permute.xlu0 %2133 }
 0x32a   : > { %2213 = vst.msk [vmem:[%s2509_s28 + $0xb8] sm:$0xff] %vm2189_vm4, %v2140_v41  ;;  %2210 = vst.msk [vmem:[%s2509_s28 + $0xa0] sm:$0xff] %vm2189_vm4, %v2134_v42 }
 0x32d   : > { %v2136_v35 = vpop.permute.xlu1 %2135 }
 0x32e   : > { %2211 = vst.msk [vmem:[%s2509_s28 + $0xa8] sm:$0xff] %vm2189_vm4, %v2136_v35 }
 0x338   : > { %v2146_v25 = vpop.permute.xlu0 %2145 }
 0x339   : > { %2216 = vst.msk [vmem:[%s2509_s28 + $0xd0] sm:$0xff] %vm2189_vm4, %v2146_v25 }
 0x33c   : > { %v2148_v33 = vpop.permute.xlu1 %2147  ;;  %v2142_v21 = vpop.permute.xlu0 %2141 }
 0x33d   : > { %2217 = vst.msk [vmem:[%s2509_s28 + $0xd8] sm:$0xff] %vm2189_vm4, %v2148_v33  ;;  %2214 = vst.msk [vmem:[%s2509_s28 + $0xc0] sm:$0xff] %vm2189_vm4, %v2142_v21 }
 0x340   : > { %v2144_v49 = vpop.permute.xlu1 %2143 }
 0x341   : > { %2215 = vst.msk [vmem:[%s2509_s28 + $0xc8] sm:$0xff] %vm2189_vm4, %v2144_v49 }
 0x34e   : > { %v2150_v30 = vpop.permute.xlu0 %2149 }
 0x34f   : > { %2218 = vst.msk [vmem:[%s2509_s28 + $0xe0] sm:$0xff] %vm2189_vm4, %v2150_v30 }
 0x352   : > { %v2152_v38 = vpop.permute.xlu1 %2151  ;;  %v2154_v62 = vpop.permute.xlu0 %2153 }
 0x353   : > { %2219 = vst.msk [vmem:[%s2509_s28 + $0xe8] sm:$0xff] %vm2189_vm4, %v2152_v38  ;;  %2220 = vst.msk [vmem:[%s2509_s28 + $0xf0] sm:$0xff] %vm2189_vm4, %v2154_v62 }
 0x356   : > { %v2156_v55 = vpop.permute.xlu1 %2155 }
 0x357   : > { %2221 = vst.msk [vmem:[%s2509_s28 + $0xf8] sm:$0xff] %vm2189_vm4, %v2156_v55 }
 0x358 PF: > { %s15_s18 = sadd.s32 1, %s2453_s18  }
 0x359   : > { %p12_p4 = scmp.ge.s32.totalorder %s15_s18, 4  }
 0x35b   :  { %14 = sbr.rel (!%p12_p4) target bundleno = 1 (0x1), region = 73 }

</bundles_post_ra>
